<compile_context>
chip_gen: v7x
topology: tpu7x:2x2x1
jax: 0.10.0
libtpu: 0.0.40
codegen_flags: <defaults>
</compile_context>

<pallas_src>
import functools

import jax
import jax.numpy as jnp
import numpy as np
from jax import lax
from jax.experimental import pallas as pl
from jax.experimental.pallas import tpu as pltpu

EPS = 1e-5  # nn.BatchNorm2d default


# ---------------------------------------------------------------------------
# Kernel 1: one conv stage (phase 1 of BN).
#   - optionally applies the PREVIOUS stage's BN scale/shift + ReLU to its input tiles on the
#     fly (so the normalized intermediate never round-trips HBM),
#   - 3x3 "same" conv of a (TH, W) row band via im2col -> a single MXU matmul,
#   - writes the pre-BN conv output and per-tile (sum, sum_sq) channel partials.
# ---------------------------------------------------------------------------
def _conv_stats_kernel(scale_ref, shift_ref, xc_ref, xt_ref, xb_ref, w_ref,
                       y_ref, stats_ref, *, apply_input_bn_relu, mxu_dtype):
    t = pl.program_id(1)
    num_t = pl.num_programs(1)
    _, TH, W, Cin = xc_ref.shape
    Cout = w_ref.shape[1]

    xc = xc_ref[0]          # (TH, W, Cin) f32 : rows [t*TH, (t+1)*TH)
    xt = xt_ref[0]          # (1,  W, Cin)     : row  t*TH - 1      (clamped at image top)
    xb = xb_ref[0]          # (1,  W, Cin)     : row (t+1)*TH       (clamped at image bottom)

    if apply_input_bn_relu:
        # Fused BN + ReLU of the previous stage (elementwise kept in f32; bf16 only on MXU path).
        scale = scale_ref[...].reshape(1, 1, Cin)
        shift = shift_ref[...].reshape(1, 1, Cin)
        xc = jnp.maximum(xc * scale + shift, 0.0)
        xt = jnp.maximum(xt * scale + shift, 0.0)
        xb = jnp.maximum(xb * scale + shift, 0.0)

    # Zero the halo rows at the image boundary (padding=1 semantics), AFTER the activation.
    xt = xt * jnp.where(t > 0, 1.0, 0.0)
    xb = xb * jnp.where(t < num_t - 1, 1.0, 0.0)

    # Assemble the zero-padded (TH+2, W+2, Cin) tile entirely in VMEM, already in MXU dtype.
    xc = xc.astype(mxu_dtype)
    xt = xt.astype(mxu_dtype)
    xb = xb.astype(mxu_dtype)
    rows = jnp.concatenate([xt, xc, xb], axis=0)                    # (TH+2, W,   Cin)
    zcol = jnp.zeros((TH + 2, 1, Cin), mxu_dtype)
    xp = jnp.concatenate([zcol, rows, zcol], axis=1)                # (TH+2, W+2, Cin)

    # im2col: (TH*W, 9*Cin) patch panel -> ONE deep MXU matmul (contraction depth 9*Cin).
    taps = []
    for dy in range(3):
        for dx in range(3):
            taps.append(xp[dy:dy + TH, dx:dx + W, :])
    patches = jnp.concatenate(taps, axis=2).reshape(TH * W, 9 * Cin)

    acc = jnp.dot(patches, w_ref[...], preferred_element_type=jnp.float32)  # (TH*W, Cout) f32
    # Conv bias intentionally omitted: training-mode BN subtracts the batch mean, which
    # cancels the bias exactly.

    y_ref[...] = acc.reshape(1, TH, W, Cout)

    # One-pass BN statistics: per-channel partial sum and sum-of-squares for this tile.
    s = jnp.sum(acc, axis=0).reshape(1, 1, 1, Cout)
    ss = jnp.sum(acc * acc, axis=0).reshape(1, 1, 1, Cout)
    stats_ref[...] = jnp.concatenate([s, ss], axis=2)


# ---------------------------------------------------------------------------
# Kernel 2: BN + ReLU epilogue for the final stage (tiled, elementwise, f32).
# ---------------------------------------------------------------------------
def _bn_relu_kernel(scale_ref, shift_ref, y_ref, o_ref):
    C = y_ref.shape[-1]
    scale = scale_ref[...].reshape(1, 1, 1, C)
    shift = shift_ref[...].reshape(1, 1, 1, C)
    o_ref[...] = jnp.maximum(y_ref[...] * scale + shift, 0.0)


# ---------------------------------------------------------------------------
# Wrappers
# ---------------------------------------------------------------------------
def _conv_stage(x_nhwc, w_mat, scale_in, shift_in, *, apply_input_bn_relu, tile_h, mxu_dtype):
    """One conv stage: returns (pre-BN conv output (N,H,W,Cout) f32, stats (N,RT,2,Cout))."""
    N, H, W, Cin = x_nhwc.shape
    KC, Cout = w_mat.shape
    TH = tile_h
    assert H % TH == 0, "tile_h must divide H"
    RT = H // TH

    kernel = functools.partial(_conv_stats_kernel,
                               apply_input_bn_relu=apply_input_bn_relu,
                               mxu_dtype=mxu_dtype)

    y_raw, stats = pl.pallas_call(
        kernel,
        out_shape=(jax.ShapeDtypeStruct((N, H, W, Cout), jnp.float32),
                   jax.ShapeDtypeStruct((N, RT, 2, Cout), jnp.float32)),
        grid_spec=pltpu.PrefetchScalarGridSpec(
            num_scalar_prefetch=0,
            grid=(N, RT),
            in_specs=[
                pl.BlockSpec((1, Cin), lambda n, t: (0, 0)),                   # BN scale (prev)
                pl.BlockSpec((1, Cin), lambda n, t: (0, 0)),                   # BN shift (prev)
                pl.BlockSpec((1, TH, W, Cin), lambda n, t: (n, t, 0, 0)),      # row band
                pl.BlockSpec((1, 1, W, Cin),                                   # top halo row
                             lambda n, t: (n, jnp.maximum(t * TH - 1, 0), 0, 0)),
                pl.BlockSpec((1, 1, W, Cin),                                   # bottom halo row
                             lambda n, t: (n, jnp.minimum((t + 1) * TH, H - 1), 0, 0)),
                pl.BlockSpec((KC, Cout), lambda n, t: (0, 0)),                 # weights (9*Cin, Cout)
            ],
            out_specs=(
                pl.BlockSpec((1, TH, W, Cout), lambda n, t: (n, t, 0, 0)),     # pre-BN conv out
                pl.BlockSpec((1, 1, 2, Cout), lambda n, t: (n, t, 0, 0)),      # (sum, sum_sq)
            ),
        ),
        compiler_params=pltpu.CompilerParams(
            dimension_semantics=("parallel", "parallel"),
            vmem_limit_bytes=32 * 1024 * 1024),
    )(scale_in, shift_in, x_nhwc, x_nhwc, x_nhwc, w_mat)
    return y_raw, stats


def _bn_relu(y_raw, scale, shift, *, tile_h):
    N, H, W, C = y_raw.shape
    TH = tile_h
    RT = H // TH
    return pl.pallas_call(
        _bn_relu_kernel,
        out_shape=jax.ShapeDtypeStruct((N, H, W, C), jnp.float32),
        grid_spec=pltpu.PrefetchScalarGridSpec(
            num_scalar_prefetch=0,
            grid=(N, RT),
            in_specs=[pl.BlockSpec((1, C), lambda n, t: (0, 0)),
                      pl.BlockSpec((1, C), lambda n, t: (0, 0)),
                      pl.BlockSpec((1, TH, W, C), lambda n, t: (n, t, 0, 0))],
            out_specs=pl.BlockSpec((1, TH, W, C), lambda n, t: (n, t, 0, 0)),
        ),
        compiler_params=pltpu.CompilerParams(
            dimension_semantics=("parallel", "parallel"),
            vmem_limit_bytes=32 * 1024 * 1024),
    )(scale, shift, y_raw)


def _bn_scale_shift(stats, gamma, beta, count):
    """Reduce per-tile partials -> per-channel (scale, shift) for y*scale + shift."""
    s = jnp.sum(stats[:, :, 0, :], axis=(0, 1))
    ss = jnp.sum(stats[:, :, 1, :], axis=(0, 1))
    mean = s / count
    var = jnp.maximum(ss / count - mean * mean, 0.0)      # biased (training-mode) variance
    scale = gamma * lax.rsqrt(var + EPS)
    shift = beta - mean * scale
    return (scale.reshape(1, -1).astype(jnp.float32),
            shift.reshape(1, -1).astype(jnp.float32))


def _weight_taps(w_oihw, dtype):
    """(Cout, Cin, 3, 3) PyTorch weight -> (9*Cin, Cout) im2col matrix (tap-major)."""
    cout, cin, kh, kw = w_oihw.shape
    return jnp.transpose(w_oihw, (2, 3, 1, 0)).reshape(kh * kw * cin, cout).astype(dtype)


def _pick_tile_h(H, target=32):
    th = 1
    for d in range(1, H + 1):
        if H % d == 0 and d <= target:
            th = d
    return th


def double_conv(x_nchw, params, tile_h=None, mxu_dtype=jnp.bfloat16):
    """DoubleConv forward: (N, C_in, H, W) f32 -> (N, C_out, H, W) f32 (training-mode BN)."""
    (w1, b1, g1, be1, w2, b2, g2, be2) = params
    del b1, b2  # exactly cancelled by the training-mode BN mean subtraction
    x = jnp.transpose(x_nchw, (0, 2, 3, 1)).astype(jnp.float32)     # NCHW -> NHWC
    N, H, W, Cin = x.shape
    TH = _pick_tile_h(H) if tile_h is None else tile_h

    w1m = _weight_taps(w1, mxu_dtype)
    w2m = _weight_taps(w2, mxu_dtype)
    count = N * H * W

    # Stage 1: conv1 (pre-BN) + batch statistics.
    one1 = jnp.ones((1, Cin), jnp.float32)
    zero1 = jnp.zeros((1, Cin), jnp.float32)
    y1, st1 = _conv_stage(x, w1m, one1, zero1,
                          apply_input_bn_relu=False, tile_h=TH, mxu_dtype=mxu_dtype)
    sc1, sh1 = _bn_scale_shift(st1, g1, be1, count)

    # Stage 2: BN1+ReLU fused into conv2's input path; conv2 (pre-BN) + batch statistics.
    y2, st2 = _conv_stage(y1, w2m, sc1, sh1,
                          apply_input_bn_relu=True, tile_h=TH, mxu_dtype=mxu_dtype)
    sc2, sh2 = _bn_scale_shift(st2, g2, be2, count)

    # Final BN2 + ReLU epilogue.
    o = _bn_relu(y2, sc2, sh2, tile_h=TH)
    return jnp.transpose(o, (0, 3, 1, 2))                           # NHWC -> NCHW


# ---------------- pure-JAX reference (PyTorch semantics) ----------------
def _ref_stage(x_nchw, w, b, gamma, beta, conv_dtype):
    y = lax.conv_general_dilated(
        x_nchw.astype(conv_dtype), w.astype(conv_dtype),
        window_strides=(1, 1), padding="SAME",
        dimension_numbers=("NCHW", "OIHW", "NCHW"),
        preferred_element_type=jnp.float32) + b[None, :, None, None]
    mean = jnp.mean(y, axis=(0, 2, 3), keepdims=True)
    var = jnp.mean((y - mean) ** 2, axis=(0, 2, 3), keepdims=True)
    y = (y - mean) * lax.rsqrt(var + EPS) * gamma[None, :, None, None] + beta[None, :, None, None]
    return jnp.maximum(y, 0.0)


def ref_double_conv(x_nchw, params, conv_dtype=jnp.float32):
    (w1, b1, g1, be1, w2, b2, g2, be2) = params
    h = _ref_stage(x_nchw, w1, b1, g1, be1, conv_dtype)
    return _ref_stage(h, w2, b2, g2, be2, conv_dtype)


def init_params(key, in_channels, out_channels, mid_channels=None):
    if not mid_channels:
        mid_channels = out_channels
    k1, k2, k3, k4 = jax.random.split(key, 4)

    def conv_init(kw, kb, cin, cout):
        bound = 1.0 / np.sqrt(cin * 9)
        w = jax.random.uniform(kw, (cout, cin, 3, 3), jnp.float32, -bound, bound)
        b = jax.random.uniform(kb, (cout,), jnp.float32, -bound, bound)
        return w, b

    w1, b1 = conv_init(k1, k2, in_channels, mid_channels)
    w2, b2 = conv_init(k3, k4, mid_channels, out_channels)
    g1, be1 = jnp.ones((mid_channels,), jnp.float32), jnp.zeros((mid_channels,), jnp.float32)
    g2, be2 = jnp.ones((out_channels,), jnp.float32), jnp.zeros((out_channels,), jnp.float32)
    return (w1, b1, g1, be1, w2, b2, g2, be2)


if __name__ == "__main__":
    key = jax.random.PRNGKey(0)
    kx, kp = jax.random.split(key)

    N, C_IN, C_OUT, H, W = 2, 4, 8, 16, 16
    x = jax.random.normal(kx, (N, C_IN, H, W), jnp.float32)
    params = init_params(kp, C_IN, C_OUT)

    # tile_h=8 -> 2 row tiles per image: exercises the halo logic and cross-tile BN reduce.
    fn = jax.jit(lambda xx: double_conv(xx, params, tile_h=8))
    out = jax.block_until_ready(fn(x))
    assert out.shape == (N, C_OUT, H, W)

    # Compare against a reference whose convolutions use the same bf16 MXU input dtype
    # (f32 accumulation); remaining differences are accumulation order + one-pass BN stats.
    ref = jax.block_until_ready(ref_double_conv(x, params, conv_dtype=jnp.bfloat16))
    np.testing.assert_allclose(np.asarray(out), np.asarray(ref), rtol=1e-2, atol=1e-2)

    print("KERNEL_OK")
</pallas_src>

<mosaic_0001>
module attributes {stable_mosaic.version = 11 : i64} {
  func.func @_conv_stats_kernel(%arg0: i32, %arg1: i32, %arg2: memref<1x4xf32, #tpu.memory_space<vmem>>, %arg3: memref<1x4xf32, #tpu.memory_space<vmem>>, %arg4: memref<1x8x16x4xf32, #tpu.memory_space<vmem>>, %arg5: memref<1x1x16x4xf32, #tpu.memory_space<vmem>>, %arg6: memref<1x1x16x4xf32, #tpu.memory_space<vmem>>, %arg7: memref<36x8xbf16, #tpu.memory_space<vmem>>, %arg8: memref<1x8x16x8xf32, #tpu.memory_space<vmem>>, %arg9: memref<1x1x2x8xf32, #tpu.memory_space<vmem>>) attributes {dimension_semantics = [#tpu.dimension_semantics<parallel>, #tpu.dimension_semantics<parallel>], iteration_bounds = array<i64: 2, 2>, scalar_prefetch = 0 : i64, scratch_operands = 0 : i64, tpu.core_type = #tpu.core_type<tc>, window_params = [{pipeline_mode = #tpu.pipeline_mode<synchronous>, transform_indices = @transform_0, window_bounds = array<i64: 1, 4>}, {pipeline_mode = #tpu.pipeline_mode<synchronous>, transform_indices = @transform_1, window_bounds = array<i64: 1, 4>}, {transform_indices = @transform_2, window_bounds = array<i64: 1, 8, 16, 4>}, {transform_indices = @transform_3, window_bounds = array<i64: 1, 1, 16, 4>}, {transform_indices = @transform_4, window_bounds = array<i64: 1, 1, 16, 4>}, {pipeline_mode = #tpu.pipeline_mode<synchronous>, transform_indices = @transform_5, window_bounds = array<i64: 36, 8>}, {transform_indices = @transform_6, window_bounds = array<i64: 1, 8, 16, 8>}, {transform_indices = @transform_7, window_bounds = array<i64: 1, 1, 2, 8>}]} {
    %c0 = arith.constant 0 : index
    %c0_0 = arith.constant 0 : index
    %c0_1 = arith.constant 0 : index
    %c0_2 = arith.constant 0 : index
    %0 = vector.load %arg4[%c0, %c0_0, %c0_1, %c0_2] : memref<1x8x16x4xf32, #tpu.memory_space<vmem>>, vector<1x8x16x4xf32>
    %1 = vector.shape_cast %0 : vector<1x8x16x4xf32> to vector<8x16x4xf32>
    %c0_3 = arith.constant 0 : index
    %c0_4 = arith.constant 0 : index
    %c0_5 = arith.constant 0 : index
    %c0_6 = arith.constant 0 : index
    %2 = vector.load %arg5[%c0_3, %c0_4, %c0_5, %c0_6] : memref<1x1x16x4xf32, #tpu.memory_space<vmem>>, vector<1x1x16x4xf32>
    %3 = vector.shape_cast %2 : vector<1x1x16x4xf32> to vector<1x16x4xf32>
    %c0_7 = arith.constant 0 : index
    %c0_8 = arith.constant 0 : index
    %c0_9 = arith.constant 0 : index
    %c0_10 = arith.constant 0 : index
    %4 = vector.load %arg6[%c0_7, %c0_8, %c0_9, %c0_10] : memref<1x1x16x4xf32, #tpu.memory_space<vmem>>, vector<1x1x16x4xf32>
    %5 = vector.shape_cast %4 : vector<1x1x16x4xf32> to vector<1x16x4xf32>
    %c0_i32 = arith.constant 0 : i32
    %6 = arith.cmpi sgt, %arg1, %c0_i32 : i32
    %cst = arith.constant 1.000000e+00 : f32
    %cst_11 = arith.constant 0.000000e+00 : f32
    %7 = arith.select %6, %cst, %cst_11 : f32
    %8 = vector.broadcast %7 : f32 to vector<1x16x4xf32>
    %9 = arith.mulf %3, %8 : vector<1x16x4xf32>
    %c1_i32 = arith.constant 1 : i32
    %10 = arith.cmpi slt, %arg1, %c1_i32 : i32
    %cst_12 = arith.constant 1.000000e+00 : f32
    %cst_13 = arith.constant 0.000000e+00 : f32
    %11 = arith.select %10, %cst_12, %cst_13 : f32
    %12 = vector.broadcast %11 : f32 to vector<1x16x4xf32>
    %13 = arith.mulf %5, %12 : vector<1x16x4xf32>
    %14 = arith.truncf %1 : vector<8x16x4xf32> to vector<8x16x4xbf16>
    %15 = arith.truncf %9 : vector<1x16x4xf32> to vector<1x16x4xbf16>
    %16 = arith.truncf %13 : vector<1x16x4xf32> to vector<1x16x4xbf16>
    %17 = tpu.concatenate %15, %14, %16 in 0 : vector<1x16x4xbf16>, vector<8x16x4xbf16>, vector<1x16x4xbf16> -> vector<10x16x4xbf16>
    %cst_14 = arith.constant 0.000000e+00 : bf16
    %18 = vector.broadcast %cst_14 : bf16 to vector<10x1x4xbf16>
    %19 = tpu.concatenate %18, %17, %18 in 1 : vector<10x1x4xbf16>, vector<10x16x4xbf16>, vector<10x1x4xbf16> -> vector<10x18x4xbf16>
    %20 = vector.extract_strided_slice %19 {offsets = [0, 0, 0], sizes = [8, 16, 4], strides = [1, 1, 1]} : vector<10x18x4xbf16> to vector<8x16x4xbf16>
    %21 = vector.extract_strided_slice %19 {offsets = [0, 1, 0], sizes = [8, 16, 4], strides = [1, 1, 1]} : vector<10x18x4xbf16> to vector<8x16x4xbf16>
    %22 = vector.extract_strided_slice %19 {offsets = [0, 2, 0], sizes = [8, 16, 4], strides = [1, 1, 1]} : vector<10x18x4xbf16> to vector<8x16x4xbf16>
    %23 = vector.extract_strided_slice %19 {offsets = [1, 0, 0], sizes = [8, 16, 4], strides = [1, 1, 1]} : vector<10x18x4xbf16> to vector<8x16x4xbf16>
    %24 = vector.extract_strided_slice %19 {offsets = [1, 1, 0], sizes = [8, 16, 4], strides = [1, 1, 1]} : vector<10x18x4xbf16> to vector<8x16x4xbf16>
    %25 = vector.extract_strided_slice %19 {offsets = [1, 2, 0], sizes = [8, 16, 4], strides = [1, 1, 1]} : vector<10x18x4xbf16> to vector<8x16x4xbf16>
    %26 = vector.extract_strided_slice %19 {offsets = [2, 0, 0], sizes = [8, 16, 4], strides = [1, 1, 1]} : vector<10x18x4xbf16> to vector<8x16x4xbf16>
    %27 = vector.extract_strided_slice %19 {offsets = [2, 1, 0], sizes = [8, 16, 4], strides = [1, 1, 1]} : vector<10x18x4xbf16> to vector<8x16x4xbf16>
    %28 = vector.extract_strided_slice %19 {offsets = [2, 2, 0], sizes = [8, 16, 4], strides = [1, 1, 1]} : vector<10x18x4xbf16> to vector<8x16x4xbf16>
    %29 = tpu.concatenate %20, %21, %22, %23, %24, %25, %26, %27, %28 in 2 : vector<8x16x4xbf16>, vector<8x16x4xbf16>, vector<8x16x4xbf16>, vector<8x16x4xbf16>, vector<8x16x4xbf16>, vector<8x16x4xbf16>, vector<8x16x4xbf16>, vector<8x16x4xbf16>, vector<8x16x4xbf16> -> vector<8x16x36xbf16>
    %30 = vector.shape_cast %29 : vector<8x16x36xbf16> to vector<128x36xbf16>
    %c0_15 = arith.constant 0 : index
    %c0_16 = arith.constant 0 : index
    %31 = vector.load %arg7[%c0_15, %c0_16] : memref<36x8xbf16, #tpu.memory_space<vmem>>, vector<36x8xbf16>
    %cst_17 = arith.constant dense<0.000000e+00> : vector<128x8xf32>
    %32 = tpu.matmul %30, %31, %cst_17 {dimension_numbers = #tpu.dot_dimension_numbers<[1], [0], [0], [1], [0, 0, 1, 1], [], []>} : vector<128x36xbf16>, vector<36x8xbf16>, vector<128x8xf32> -> vector<128x8xf32>
    %33 = vector.shape_cast %32 : vector<128x8xf32> to vector<1x8x16x8xf32>
    %c0_18 = arith.constant 0 : index
    %c0_19 = arith.constant 0 : index
    %c0_20 = arith.constant 0 : index
    %c0_21 = arith.constant 0 : index
    %34 = vector.load %arg8[%c0_18, %c0_19, %c0_20, %c0_21] : memref<1x8x16x8xf32, #tpu.memory_space<vmem>>, vector<1x8x16x8xf32>
    tpu.vector_store %arg8[%c0_18, %c0_19, %c0_20, %c0_21], %33 {strides = array<i32>} : memref<1x8x16x8xf32, #tpu.memory_space<vmem>>, vector<1x8x16x8xf32>,
    %cst_22 = arith.constant dense<0.000000e+00> : vector<8xf32>
    %35 = vector.multi_reduction <add>, %32, %cst_22 [0] : vector<128x8xf32> to vector<8xf32>
    %36 = vector.shape_cast %35 : vector<8xf32> to vector<1x1x1x8xf32>
    %37 = arith.mulf %32, %32 : vector<128x8xf32>
    %cst_23 = arith.constant dense<0.000000e+00> : vector<8xf32>
    %38 = vector.multi_reduction <add>, %37, %cst_23 [0] : vector<128x8xf32> to vector<8xf32>
    %39 = vector.shape_cast %38 : vector<8xf32> to vector<1x1x1x8xf32>
    %40 = tpu.concatenate %36, %39 in 2 : vector<1x1x1x8xf32>, vector<1x1x1x8xf32> -> vector<1x1x2x8xf32>
    %c0_24 = arith.constant 0 : index
    %c0_25 = arith.constant 0 : index
    %c0_26 = arith.constant 0 : index
    %c0_27 = arith.constant 0 : index
    %41 = vector.load %arg9[%c0_24, %c0_25, %c0_26, %c0_27] : memref<1x1x2x8xf32, #tpu.memory_space<vmem>>, vector<1x1x2x8xf32>
    tpu.vector_store %arg9[%c0_24, %c0_25, %c0_26, %c0_27], %40 {strides = array<i32>} : memref<1x1x2x8xf32, #tpu.memory_space<vmem>>, vector<1x1x2x8xf32>,
    return
  }
  func.func @transform_0(%arg0: i32, %arg1: i32) -> (i32, i32) {
    %c0_i32 = arith.constant 0 : i32
    %c0_i32_0 = arith.constant 0 : i32
    %c0_i32_1 = arith.constant 0 : i32
    return %c0_i32, %c0_i32_0 : i32, i32
  }
  func.func @transform_1(%arg0: i32, %arg1: i32) -> (i32, i32) {
    %c0_i32 = arith.constant 0 : i32
    %c0_i32_0 = arith.constant 0 : i32
    %c0_i32_1 = arith.constant 0 : i32
    return %c0_i32, %c0_i32_0 : i32, i32
  }
  func.func @transform_2(%arg0: i32, %arg1: i32) -> (i32, i32, i32, i32) {
    %c0_i32 = arith.constant 0 : i32
    %c0_i32_0 = arith.constant 0 : i32
    %c0_i32_1 = arith.constant 0 : i32
    return %arg0, %arg1, %c0_i32, %c0_i32_0 : i32, i32, i32, i32
  }
  func.func @transform_3(%arg0: i32, %arg1: i32) -> (i32, i32, i32, i32) {
    %c8_i32 = arith.constant 8 : i32
    %0 = arith.muli %arg1, %c8_i32 : i32
    %c1_i32 = arith.constant 1 : i32
    %1 = arith.subi %0, %c1_i32 : i32
    %c0_i32 = arith.constant 0 : i32
    %2 = arith.maxsi %1, %c0_i32 : i32
    %c0_i32_0 = arith.constant 0 : i32
    %c0_i32_1 = arith.constant 0 : i32
    %c0_i32_2 = arith.constant 0 : i32
    return %arg0, %2, %c0_i32_0, %c0_i32_1 : i32, i32, i32, i32
  }
  func.func @transform_4(%arg0: i32, %arg1: i32) -> (i32, i32, i32, i32) {
    %c1_i32 = arith.constant 1 : i32
    %0 = arith.addi %arg1, %c1_i32 : i32
    %c8_i32 = arith.constant 8 : i32
    %1 = arith.muli %0, %c8_i32 : i32
    %c15_i32 = arith.constant 15 : i32
    %2 = arith.minsi %1, %c15_i32 : i32
    %c0_i32 = arith.constant 0 : i32
    %c0_i32_0 = arith.constant 0 : i32
    %c0_i32_1 = arith.constant 0 : i32
    return %arg0, %2, %c0_i32, %c0_i32_0 : i32, i32, i32, i32
  }
  func.func @transform_5(%arg0: i32, %arg1: i32) -> (i32, i32) {
    %c0_i32 = arith.constant 0 : i32
    %c0_i32_0 = arith.constant 0 : i32
    %c0_i32_1 = arith.constant 0 : i32
    return %c0_i32, %c0_i32_0 : i32, i32
  }
  func.func @transform_6(%arg0: i32, %arg1: i32) -> (i32, i32, i32, i32) {
    %c0_i32 = arith.constant 0 : i32
    %c0_i32_0 = arith.constant 0 : i32
    %c0_i32_1 = arith.constant 0 : i32
    return %arg0, %arg1, %c0_i32, %c0_i32_0 : i32, i32, i32, i32
  }
  func.func @transform_7(%arg0: i32, %arg1: i32) -> (i32, i32, i32, i32) {
    %c0_i32 = arith.constant 0 : i32
    %c0_i32_0 = arith.constant 0 : i32
    %c0_i32_1 = arith.constant 0 : i32
    return %arg0, %arg1, %c0_i32, %c0_i32_0 : i32, i32, i32, i32
  }
}

module attributes {stable_mosaic.version = 11 : i64} {
  func.func @_conv_stats_kernel(%arg0: i32, %arg1: i32, %arg2: memref<1x8xf32, #tpu.memory_space<vmem>>, %arg3: memref<1x8xf32, #tpu.memory_space<vmem>>, %arg4: memref<1x8x16x8xf32, #tpu.memory_space<vmem>>, %arg5: memref<1x1x16x8xf32, #tpu.memory_space<vmem>>, %arg6: memref<1x1x16x8xf32, #tpu.memory_space<vmem>>, %arg7: memref<72x8xbf16, #tpu.memory_space<vmem>>, %arg8: memref<1x8x16x8xf32, #tpu.memory_space<vmem>>, %arg9: memref<1x1x2x8xf32, #tpu.memory_space<vmem>>) attributes {dimension_semantics = [#tpu.dimension_semantics<parallel>, #tpu.dimension_semantics<parallel>], iteration_bounds = array<i64: 2, 2>, scalar_prefetch = 0 : i64, scratch_operands = 0 : i64, tpu.core_type = #tpu.core_type<tc>, window_params = [{pipeline_mode = #tpu.pipeline_mode<synchronous>, transform_indices = @transform_0, window_bounds = array<i64: 1, 8>}, {pipeline_mode = #tpu.pipeline_mode<synchronous>, transform_indices = @transform_1, window_bounds = array<i64: 1, 8>}, {transform_indices = @transform_2, window_bounds = array<i64: 1, 8, 16, 8>}, {transform_indices = @transform_3, window_bounds = array<i64: 1, 1, 16, 8>}, {transform_indices = @transform_4, window_bounds = array<i64: 1, 1, 16, 8>}, {pipeline_mode = #tpu.pipeline_mode<synchronous>, transform_indices = @transform_5, window_bounds = array<i64: 72, 8>}, {transform_indices = @transform_6, window_bounds = array<i64: 1, 8, 16, 8>}, {transform_indices = @transform_7, window_bounds = array<i64: 1, 1, 2, 8>}]} {
    %c0 = arith.constant 0 : index
    %c0_0 = arith.constant 0 : index
    %c0_1 = arith.constant 0 : index
    %c0_2 = arith.constant 0 : index
    %0 = vector.load %arg4[%c0, %c0_0, %c0_1, %c0_2] : memref<1x8x16x8xf32, #tpu.memory_space<vmem>>, vector<1x8x16x8xf32>
    %1 = vector.shape_cast %0 : vector<1x8x16x8xf32> to vector<8x16x8xf32>
    %c0_3 = arith.constant 0 : index
    %c0_4 = arith.constant 0 : index
    %c0_5 = arith.constant 0 : index
    %c0_6 = arith.constant 0 : index
    %2 = vector.load %arg5[%c0_3, %c0_4, %c0_5, %c0_6] : memref<1x1x16x8xf32, #tpu.memory_space<vmem>>, vector<1x1x16x8xf32>
    %3 = vector.shape_cast %2 : vector<1x1x16x8xf32> to vector<1x16x8xf32>
    %c0_7 = arith.constant 0 : index
    %c0_8 = arith.constant 0 : index
    %c0_9 = arith.constant 0 : index
    %c0_10 = arith.constant 0 : index
    %4 = vector.load %arg6[%c0_7, %c0_8, %c0_9, %c0_10] : memref<1x1x16x8xf32, #tpu.memory_space<vmem>>, vector<1x1x16x8xf32>
    %5 = vector.shape_cast %4 : vector<1x1x16x8xf32> to vector<1x16x8xf32>
    %c0_11 = arith.constant 0 : index
    %c0_12 = arith.constant 0 : index
    %6 = vector.load %arg2[%c0_11, %c0_12] : memref<1x8xf32, #tpu.memory_space<vmem>>, vector<1x8xf32>
    %7 = vector.shape_cast %6 : vector<1x8xf32> to vector<1x1x8xf32>
    %c0_13 = arith.constant 0 : index
    %c0_14 = arith.constant 0 : index
    %8 = vector.load %arg3[%c0_13, %c0_14] : memref<1x8xf32, #tpu.memory_space<vmem>>, vector<1x8xf32>
    %9 = vector.shape_cast %8 : vector<1x8xf32> to vector<1x1x8xf32>
    %10 = vector.broadcast %7 : vector<1x1x8xf32> to vector<8x16x8xf32>
    %11 = arith.mulf %1, %10 : vector<8x16x8xf32>
    %12 = vector.broadcast %9 : vector<1x1x8xf32> to vector<8x16x8xf32>
    %13 = arith.addf %11, %12 : vector<8x16x8xf32>
    %cst = arith.constant 0.000000e+00 : f32
    %14 = vector.broadcast %cst : f32 to vector<8x16x8xf32>
    %15 = arith.maximumf %13, %14 : vector<8x16x8xf32>
    %16 = vector.broadcast %7 : vector<1x1x8xf32> to vector<1x16x8xf32>
    %17 = arith.mulf %3, %16 : vector<1x16x8xf32>
    %18 = vector.broadcast %9 : vector<1x1x8xf32> to vector<1x16x8xf32>
    %19 = arith.addf %17, %18 : vector<1x16x8xf32>
    %cst_15 = arith.constant 0.000000e+00 : f32
    %20 = vector.broadcast %cst_15 : f32 to vector<1x16x8xf32>
    %21 = arith.maximumf %19, %20 : vector<1x16x8xf32>
    %22 = vector.broadcast %7 : vector<1x1x8xf32> to vector<1x16x8xf32>
    %23 = arith.mulf %5, %22 : vector<1x16x8xf32>
    %24 = vector.broadcast %9 : vector<1x1x8xf32> to vector<1x16x8xf32>
    %25 = arith.addf %23, %24 : vector<1x16x8xf32>
    %cst_16 = arith.constant 0.000000e+00 : f32
    %26 = vector.broadcast %cst_16 : f32 to vector<1x16x8xf32>
    %27 = arith.maximumf %25, %26 : vector<1x16x8xf32>
    %c0_i32 = arith.constant 0 : i32
    %28 = arith.cmpi sgt, %arg1, %c0_i32 : i32
    %cst_17 = arith.constant 1.000000e+00 : f32
    %cst_18 = arith.constant 0.000000e+00 : f32
    %29 = arith.select %28, %cst_17, %cst_18 : f32
    %30 = vector.broadcast %29 : f32 to vector<1x16x8xf32>
    %31 = arith.mulf %21, %30 : vector<1x16x8xf32>
    %c1_i32 = arith.constant 1 : i32
    %32 = arith.cmpi slt, %arg1, %c1_i32 : i32
    %cst_19 = arith.constant 1.000000e+00 : f32
    %cst_20 = arith.constant 0.000000e+00 : f32
    %33 = arith.select %32, %cst_19, %cst_20 : f32
    %34 = vector.broadcast %33 : f32 to vector<1x16x8xf32>
    %35 = arith.mulf %27, %34 : vector<1x16x8xf32>
    %36 = arith.truncf %15 : vector<8x16x8xf32> to vector<8x16x8xbf16>
    %37 = arith.truncf %31 : vector<1x16x8xf32> to vector<1x16x8xbf16>
    %38 = arith.truncf %35 : vector<1x16x8xf32> to vector<1x16x8xbf16>
    %39 = tpu.concatenate %37, %36, %38 in 0 : vector<1x16x8xbf16>, vector<8x16x8xbf16>, vector<1x16x8xbf16> -> vector<10x16x8xbf16>
    %cst_21 = arith.constant 0.000000e+00 : bf16
    %40 = vector.broadcast %cst_21 : bf16 to vector<10x1x8xbf16>
    %41 = tpu.concatenate %40, %39, %40 in 1 : vector<10x1x8xbf16>, vector<10x16x8xbf16>, vector<10x1x8xbf16> -> vector<10x18x8xbf16>
    %42 = vector.extract_strided_slice %41 {offsets = [0, 0, 0], sizes = [8, 16, 8], strides = [1, 1, 1]} : vector<10x18x8xbf16> to vector<8x16x8xbf16>
    %43 = vector.extract_strided_slice %41 {offsets = [0, 1, 0], sizes = [8, 16, 8], strides = [1, 1, 1]} : vector<10x18x8xbf16> to vector<8x16x8xbf16>
    %44 = vector.extract_strided_slice %41 {offsets = [0, 2, 0], sizes = [8, 16, 8], strides = [1, 1, 1]} : vector<10x18x8xbf16> to vector<8x16x8xbf16>
    %45 = vector.extract_strided_slice %41 {offsets = [1, 0, 0], sizes = [8, 16, 8], strides = [1, 1, 1]} : vector<10x18x8xbf16> to vector<8x16x8xbf16>
    %46 = vector.extract_strided_slice %41 {offsets = [1, 1, 0], sizes = [8, 16, 8], strides = [1, 1, 1]} : vector<10x18x8xbf16> to vector<8x16x8xbf16>
    %47 = vector.extract_strided_slice %41 {offsets = [1, 2, 0], sizes = [8, 16, 8], strides = [1, 1, 1]} : vector<10x18x8xbf16> to vector<8x16x8xbf16>
    %48 = vector.extract_strided_slice %41 {offsets = [2, 0, 0], sizes = [8, 16, 8], strides = [1, 1, 1]} : vector<10x18x8xbf16> to vector<8x16x8xbf16>
    %49 = vector.extract_strided_slice %41 {offsets = [2, 1, 0], sizes = [8, 16, 8], strides = [1, 1, 1]} : vector<10x18x8xbf16> to vector<8x16x8xbf16>
    %50 = vector.extract_strided_slice %41 {offsets = [2, 2, 0], sizes = [8, 16, 8], strides = [1, 1, 1]} : vector<10x18x8xbf16> to vector<8x16x8xbf16>
    %51 = tpu.concatenate %42, %43, %44, %45, %46, %47, %48, %49, %50 in 2 : vector<8x16x8xbf16>, vector<8x16x8xbf16>, vector<8x16x8xbf16>, vector<8x16x8xbf16>, vector<8x16x8xbf16>, vector<8x16x8xbf16>, vector<8x16x8xbf16>, vector<8x16x8xbf16>, vector<8x16x8xbf16> -> vector<8x16x72xbf16>
    %52 = vector.shape_cast %51 : vector<8x16x72xbf16> to vector<128x72xbf16>
    %c0_22 = arith.constant 0 : index
    %c0_23 = arith.constant 0 : index
    %53 = vector.load %arg7[%c0_22, %c0_23] : memref<72x8xbf16, #tpu.memory_space<vmem>>, vector<72x8xbf16>
    %cst_24 = arith.constant dense<0.000000e+00> : vector<128x8xf32>
    %54 = tpu.matmul %52, %53, %cst_24 {dimension_numbers = #tpu.dot_dimension_numbers<[1], [0], [0], [1], [0, 0, 1, 1], [], []>} : vector<128x72xbf16>, vector<72x8xbf16>, vector<128x8xf32> -> vector<128x8xf32>
    %55 = vector.shape_cast %54 : vector<128x8xf32> to vector<1x8x16x8xf32>
    %c0_25 = arith.constant 0 : index
    %c0_26 = arith.constant 0 : index
    %c0_27 = arith.constant 0 : index
    %c0_28 = arith.constant 0 : index
    %56 = vector.load %arg8[%c0_25, %c0_26, %c0_27, %c0_28] : memref<1x8x16x8xf32, #tpu.memory_space<vmem>>, vector<1x8x16x8xf32>
    tpu.vector_store %arg8[%c0_25, %c0_26, %c0_27, %c0_28], %55 {strides = array<i32>} : memref<1x8x16x8xf32, #tpu.memory_space<vmem>>, vector<1x8x16x8xf32>,
    %cst_29 = arith.constant dense<0.000000e+00> : vector<8xf32>
    %57 = vector.multi_reduction <add>, %54, %cst_29 [0] : vector<128x8xf32> to vector<8xf32>
    %58 = vector.shape_cast %57 : vector<8xf32> to vector<1x1x1x8xf32>
    %59 = arith.mulf %54, %54 : vector<128x8xf32>
    %cst_30 = arith.constant dense<0.000000e+00> : vector<8xf32>
    %60 = vector.multi_reduction <add>, %59, %cst_30 [0] : vector<128x8xf32> to vector<8xf32>
    %61 = vector.shape_cast %60 : vector<8xf32> to vector<1x1x1x8xf32>
    %62 = tpu.concatenate %58, %61 in 2 : vector<1x1x1x8xf32>, vector<1x1x1x8xf32> -> vector<1x1x2x8xf32>
    %c0_31 = arith.constant 0 : index
    %c0_32 = arith.constant 0 : index
    %c0_33 = arith.constant 0 : index
    %c0_34 = arith.constant 0 : index
    %63 = vector.load %arg9[%c0_31, %c0_32, %c0_33, %c0_34] : memref<1x1x2x8xf32, #tpu.memory_space<vmem>>, vector<1x1x2x8xf32>
    tpu.vector_store %arg9[%c0_31, %c0_32, %c0_33, %c0_34], %62 {strides = array<i32>} : memref<1x1x2x8xf32, #tpu.memory_space<vmem>>, vector<1x1x2x8xf32>,
    return
  }
  func.func @transform_0(%arg0: i32, %arg1: i32) -> (i32, i32) {
    %c0_i32 = arith.constant 0 : i32
    %c0_i32_0 = arith.constant 0 : i32
    %c0_i32_1 = arith.constant 0 : i32
    return %c0_i32, %c0_i32_0 : i32, i32
  }
  func.func @transform_1(%arg0: i32, %arg1: i32) -> (i32, i32) {
    %c0_i32 = arith.constant 0 : i32
    %c0_i32_0 = arith.constant 0 : i32
    %c0_i32_1 = arith.constant 0 : i32
    return %c0_i32, %c0_i32_0 : i32, i32
  }
  func.func @transform_2(%arg0: i32, %arg1: i32) -> (i32, i32, i32, i32) {
    %c0_i32 = arith.constant 0 : i32
    %c0_i32_0 = arith.constant 0 : i32
    %c0_i32_1 = arith.constant 0 : i32
    return %arg0, %arg1, %c0_i32, %c0_i32_0 : i32, i32, i32, i32
  }
  func.func @transform_3(%arg0: i32, %arg1: i32) -> (i32, i32, i32, i32) {
    %c8_i32 = arith.constant 8 : i32
    %0 = arith.muli %arg1, %c8_i32 : i32
    %c1_i32 = arith.constant 1 : i32
    %1 = arith.subi %0, %c1_i32 : i32
    %c0_i32 = arith.constant 0 : i32
    %2 = arith.maxsi %1, %c0_i32 : i32
    %c0_i32_0 = arith.constant 0 : i32
    %c0_i32_1 = arith.constant 0 : i32
    %c0_i32_2 = arith.constant 0 : i32
    return %arg0, %2, %c0_i32_0, %c0_i32_1 : i32, i32, i32, i32
  }
  func.func @transform_4(%arg0: i32, %arg1: i32) -> (i32, i32, i32, i32) {
    %c1_i32 = arith.constant 1 : i32
    %0 = arith.addi %arg1, %c1_i32 : i32
    %c8_i32 = arith.constant 8 : i32
    %1 = arith.muli %0, %c8_i32 : i32
    %c15_i32 = arith.constant 15 : i32
    %2 = arith.minsi %1, %c15_i32 : i32
    %c0_i32 = arith.constant 0 : i32
    %c0_i32_0 = arith.constant 0 : i32
    %c0_i32_1 = arith.constant 0 : i32
    return %arg0, %2, %c0_i32, %c0_i32_0 : i32, i32, i32, i32
  }
  func.func @transform_5(%arg0: i32, %arg1: i32) -> (i32, i32) {
    %c0_i32 = arith.constant 0 : i32
    %c0_i32_0 = arith.constant 0 : i32
    %c0_i32_1 = arith.constant 0 : i32
    return %c0_i32, %c0_i32_0 : i32, i32
  }
  func.func @transform_6(%arg0: i32, %arg1: i32) -> (i32, i32, i32, i32) {
    %c0_i32 = arith.constant 0 : i32
    %c0_i32_0 = arith.constant 0 : i32
    %c0_i32_1 = arith.constant 0 : i32
    return %arg0, %arg1, %c0_i32, %c0_i32_0 : i32, i32, i32, i32
  }
  func.func @transform_7(%arg0: i32, %arg1: i32) -> (i32, i32, i32, i32) {
    %c0_i32 = arith.constant 0 : i32
    %c0_i32_0 = arith.constant 0 : i32
    %c0_i32_1 = arith.constant 0 : i32
    return %arg0, %arg1, %c0_i32, %c0_i32_0 : i32, i32, i32, i32
  }
}

module attributes {stable_mosaic.version = 11 : i64} {
  func.func @_bn_relu_kernel(%arg0: i32, %arg1: i32, %arg2: memref<1x8xf32, #tpu.memory_space<vmem>>, %arg3: memref<1x8xf32, #tpu.memory_space<vmem>>, %arg4: memref<1x8x16x8xf32, #tpu.memory_space<vmem>>, %arg5: memref<1x8x16x8xf32, #tpu.memory_space<vmem>>) attributes {dimension_semantics = [#tpu.dimension_semantics<parallel>, #tpu.dimension_semantics<parallel>], iteration_bounds = array<i64: 2, 2>, scalar_prefetch = 0 : i64, scratch_operands = 0 : i64, tpu.core_type = #tpu.core_type<tc>, window_params = [{pipeline_mode = #tpu.pipeline_mode<synchronous>, transform_indices = @transform_0, window_bounds = array<i64: 1, 8>}, {pipeline_mode = #tpu.pipeline_mode<synchronous>, transform_indices = @transform_1, window_bounds = array<i64: 1, 8>}, {transform_indices = @transform_2, window_bounds = array<i64: 1, 8, 16, 8>}, {transform_indices = @transform_3, window_bounds = array<i64: 1, 8, 16, 8>}]} {
    %c0 = arith.constant 0 : index
    %c0_0 = arith.constant 0 : index
    %0 = vector.load %arg2[%c0, %c0_0] : memref<1x8xf32, #tpu.memory_space<vmem>>, vector<1x8xf32>
    %1 = vector.shape_cast %0 : vector<1x8xf32> to vector<1x1x1x8xf32>
    %c0_1 = arith.constant 0 : index
    %c0_2 = arith.constant 0 : index
    %2 = vector.load %arg3[%c0_1, %c0_2] : memref<1x8xf32, #tpu.memory_space<vmem>>, vector<1x8xf32>
    %3 = vector.shape_cast %2 : vector<1x8xf32> to vector<1x1x1x8xf32>
    %c0_3 = arith.constant 0 : index
    %c0_4 = arith.constant 0 : index
    %c0_5 = arith.constant 0 : index
    %c0_6 = arith.constant 0 : index
    %4 = vector.load %arg4[%c0_3, %c0_4, %c0_5, %c0_6] : memref<1x8x16x8xf32, #tpu.memory_space<vmem>>, vector<1x8x16x8xf32>
    %5 = vector.broadcast %1 : vector<1x1x1x8xf32> to vector<1x8x16x8xf32>
    %6 = arith.mulf %4, %5 : vector<1x8x16x8xf32>
    %7 = vector.broadcast %3 : vector<1x1x1x8xf32> to vector<1x8x16x8xf32>
    %8 = arith.addf %6, %7 : vector<1x8x16x8xf32>
    %cst = arith.constant 0.000000e+00 : f32
    %9 = vector.broadcast %cst : f32 to vector<1x8x16x8xf32>
    %10 = arith.maximumf %8, %9 : vector<1x8x16x8xf32>
    %c0_7 = arith.constant 0 : index
    %c0_8 = arith.constant 0 : index
    %c0_9 = arith.constant 0 : index
    %c0_10 = arith.constant 0 : index
    %11 = vector.load %arg5[%c0_7, %c0_8, %c0_9, %c0_10] : memref<1x8x16x8xf32, #tpu.memory_space<vmem>>, vector<1x8x16x8xf32>
    tpu.vector_store %arg5[%c0_7, %c0_8, %c0_9, %c0_10], %10 {strides = array<i32>} : memref<1x8x16x8xf32, #tpu.memory_space<vmem>>, vector<1x8x16x8xf32>,
    return
  }
  func.func @transform_0(%arg0: i32, %arg1: i32) -> (i32, i32) {
    %c0_i32 = arith.constant 0 : i32
    %c0_i32_0 = arith.constant 0 : i32
    %c0_i32_1 = arith.constant 0 : i32
    return %c0_i32, %c0_i32_0 : i32, i32
  }
  func.func @transform_1(%arg0: i32, %arg1: i32) -> (i32, i32) {
    %c0_i32 = arith.constant 0 : i32
    %c0_i32_0 = arith.constant 0 : i32
    %c0_i32_1 = arith.constant 0 : i32
    return %c0_i32, %c0_i32_0 : i32, i32
  }
  func.func @transform_2(%arg0: i32, %arg1: i32) -> (i32, i32, i32, i32) {
    %c0_i32 = arith.constant 0 : i32
    %c0_i32_0 = arith.constant 0 : i32
    %c0_i32_1 = arith.constant 0 : i32
    return %arg0, %arg1, %c0_i32, %c0_i32_0 : i32, i32, i32, i32
  }
  func.func @transform_3(%arg0: i32, %arg1: i32) -> (i32, i32, i32, i32) {
    %c0_i32 = arith.constant 0 : i32
    %c0_i32_0 = arith.constant 0 : i32
    %c0_i32_1 = arith.constant 0 : i32
    return %arg0, %arg1, %c0_i32, %c0_i32_0 : i32, i32, i32, i32
  }
}

</mosaic_0001>

<bundles_post_ra>
// kernel: _lambda_.5
= control target key start
LH: loop header
LB: loop body
LE: loop exit
PB: predicated region body
PF: predicated region fallthrough
CT: control target
= control target key end

     0   :  { %s526_s12 = smov 0   ;;  %s528_s13 = smov 0   ;;  %s671_s0 = inlined_call_operand.vmem [shape: f32[1,8], index: 0, kind: input, shape index: {}]   ;;  %s672_s1 = inlined_call_operand.vmem [shape: f32[1,8], index: 1, kind: input, shape index: {}]   ;;  %s673_s2 = inlined_call_operand.vmem [shape: f32[2,16,16,8], index: 2, kind: input, shape index: {}]   ;;  %s674_s3 = inlined_call_operand.vmem [shape: f32[2,16,16,8], index: 3, kind: output, shape index: {}]  }
   0x1   :  { %s530_s14 = smov 0   ;;  %s532_s15 = smov 0  }
   0x2   :  { %s534_s16 = smov 0  }
   0x3 LB: > { %s22_s17 = sadd.s32 1, %s496_s14  ;;  %s25_s18 = sadd.s32 1, %s500_s15  ;;  %s504_s16 = sphi %s534_s16, %s13_s16   ;;  %s500_s15 = sphi %s532_s15, %s678_s15   ;;  %s496_s14 = sphi %s530_s14, %s677_s14   ;;  %s492_s13 = sphi %s528_s13, %s676_s13   ;;  %s488_s12 = sphi %s526_s12, %s675_s12  }
   0x4   : > { %p23_p0 = scmp.ge.s32.totalorder %s22_s17, 2  ;;  %p413_p1 = scmp.ge.s32.totalorder %s504_s16, 1 }
   0x5   : > { %p159_p2 = scmp.lt.s32.totalorder %s504_s16, 5 }
   0x6   : > { %s680_s17 = smov (%p23_p0, %s22_s17), 0  ;;  %s682_s18 = smov (!%p23_p0, %s25_s18), %s500_s15 }
   0x7   : > { %p160_p3 = pnand %p413_p1, %p159_p2  ;;  %p27_p4 = scmp.ge.s32.totalorder %s682_s18, 2 }
   0x8   : > { %s414_s19 = sshll.u32 (!%p160_p3), %s488_s12, 3  ;;  %p194_p5 = scmp.lt.s32.totalorder (!%p160_p3), %s492_s13, 1  ;;  %v559_v0 = vld [vmem:[%s671_s0] ss:$0 sm:$0xff] (!%p160_p3)  ;;  %vm293_vm0 = vcmask (!%p160_p3), 64512  }
   0x9   : > { %s684_s18 = smov (%p27_p4, %s682_s18), 0  ;;  %163 = sbr.rel (%p160_p3) target bundleno = 39 (0x27), region = 32 }
   0xa   : > { %p196_p6 = scmp.lt.s32.totalorder (!%p160_p3), %s414_s19, 15  ;;  %v569_v1 = vld [vmem:[%s672_s1] ss:$0 sm:$0xff] (!%p160_p3) }
  0x10   : > { %s686_s13 = smov (!%p194_p5, %s492_s13), 1  ;;  %s688_s19 = smov (!%p196_p6, %s414_s19), 15 }
  0x11   : > { %s416_s20 = sshll.u32 %s686_s13, 5  ;;  %s415_s21 = sshll.u32 %s688_s19, 1 }
  0x12   : > { %s200_s22 = sadd.s32 %s416_s20, %s415_s21 }
  0x13   : > { %s417_s23 = sshll.u32 %s200_s22, 3 }
  0x14   : > { %s564_s28 = scalar_lea.vmem %s673_s2, %s417_s23  ;;  %s592_s6 = scalar_lea.vmem %s674_s3, %s417_s23 }
  0x15   : > { %v217_v2 = vld [vmem:[%s564_s28] sm:$0xff]  ;;  %v218_v3 = vld [vmem:[%s564_s28 + $0x8] sm:$0xff]  ;;  %v219_v4 = vld [vmem:[%s564_s28 + $0x10] sm:$0xff] }
  0x16   : > { %v239_v5 = vmul.f32 %v559_v0, %v217_v2  ;;  %v240_v6 = vmul.f32 %v559_v0, %v218_v3  ;;  %v241_v7 = vmul.f32 %v559_v0, %v219_v4  ;;  %v220_v8 = vld [vmem:[%s564_s28 + $0x18] sm:$0xff]  ;;  %v221_v9 = vld [vmem:[%s564_s28 + $0x20] sm:$0xff]  ;;  %v222_v10 = vld [vmem:[%s564_s28 + $0x28] sm:$0xff] }
  0x17   : > { %v242_v11 = vmul.f32 %v559_v0, %v220_v8  ;;  %v243_v12 = vmul.f32 %v559_v0, %v221_v9  ;;  %v244_v13 = vmul.f32 %v559_v0, %v222_v10  ;;  %v223_v14 = vld [vmem:[%s564_s28 + $0x30] sm:$0xff]  ;;  %v224_v15 = vld [vmem:[%s564_s28 + $0x38] sm:$0xff]  ;;  %v225_v24 = vld [vmem:[%s564_s28 + $0x40] sm:$0xff] }
  0x18   : > { %v261_v16 = vadd.f32 %v569_v1, %v239_v5  ;;  %v262_v17 = vadd.f32 %v569_v1, %v240_v6  ;;  %v263_v18 = vadd.f32 %v569_v1, %v241_v7  ;;  %v245_v19 = vmul.f32 %v559_v0, %v223_v14  ;;  %v226_v25 = vld [vmem:[%s564_s28 + $0x48] sm:$0xff]  ;;  %v227_v26 = vld [vmem:[%s564_s28 + $0x50] sm:$0xff]  ;;  %v228_v31 = vld [vmem:[%s564_s28 + $0x58] sm:$0xff] }
  0x19   : > { %v264_v20 = vadd.f32 %v569_v1, %v242_v11  ;;  %v265_v21 = vadd.f32 %v569_v1, %v243_v12  ;;  %v266_v22 = vadd.f32 %v569_v1, %v244_v13  ;;  %v246_v23 = vmul.f32 %v559_v0, %v224_v15  ;;  %v229_v32 = vld [vmem:[%s564_s28 + $0x60] sm:$0xff]  ;;  %v230_v33 = vld [vmem:[%s564_s28 + $0x68] sm:$0xff]  ;;  %v231_v38 = vld [vmem:[%s564_s28 + $0x70] sm:$0xff] }
  0x1a   : > { %v277_v27 = vmax.f32 %v261_v16, 0.0  ;;  %v278_v28 = vmax.f32 %v262_v17, 0.0  ;;  %v279_v29 = vmax.f32 %v263_v18, 0.0  ;;  %v267_v30 = vadd.f32 %v569_v1, %v245_v19  ;;  %v232_v43 = vld [vmem:[%s564_s28 + $0x78] sm:$0xff] }
  0x1b   : > { %v280_v34 = vmax.f32 %v264_v20, 0.0  ;;  %v281_v35 = vmax.f32 %v265_v21, 0.0  ;;  %v282_v36 = vmax.f32 %v266_v22, 0.0  ;;  %v268_v37 = vadd.f32 %v569_v1, %v246_v23 }
  0x1c   : > { %294 = vst.msk [vmem:[%s592_s6] sm:$0xff] %vm293_vm0, %v277_v27  ;;  %295 = vst.msk [vmem:[%s592_s6 + $0x8] sm:$0xff] %vm293_vm0, %v278_v28  ;;  %v283_v39 = vmax.f32 %v267_v30, 0.0  ;;  %v247_v40 = vmul.f32 %v559_v0, %v225_v24  ;;  %v248_v41 = vmul.f32 %v559_v0, %v226_v25  ;;  %v249_v42 = vmul.f32 %v559_v0, %v227_v26 }
  0x1d   : > { %296 = vst.msk [vmem:[%s592_s6 + $0x10] sm:$0xff] %vm293_vm0, %v279_v29  ;;  %297 = vst.msk [vmem:[%s592_s6 + $0x18] sm:$0xff] %vm293_vm0, %v280_v34  ;;  %v284_v44 = vmax.f32 %v268_v37, 0.0  ;;  %v250_v45 = vmul.f32 %v559_v0, %v228_v31  ;;  %v251_v46 = vmul.f32 %v559_v0, %v229_v32  ;;  %v252_v47 = vmul.f32 %v559_v0, %v230_v33 }
  0x1e   : > { %298 = vst.msk [vmem:[%s592_s6 + $0x20] sm:$0xff] %vm293_vm0, %v281_v35  ;;  %299 = vst.msk [vmem:[%s592_s6 + $0x28] sm:$0xff] %vm293_vm0, %v282_v36  ;;  %v269_v48 = vadd.f32 %v569_v1, %v247_v40  ;;  %v270_v49 = vadd.f32 %v569_v1, %v248_v41  ;;  %v271_v50 = vadd.f32 %v569_v1, %v249_v42 }
  0x1f   : > { %300 = vst.msk [vmem:[%s592_s6 + $0x30] sm:$0xff] %vm293_vm0, %v283_v39  ;;  %v253_v51 = vmul.f32 %v559_v0, %v231_v38  ;;  %301 = vst.msk [vmem:[%s592_s6 + $0x38] sm:$0xff] %vm293_vm0, %v284_v44  ;;  %v272_v52 = vadd.f32 %v569_v1, %v250_v45  ;;  %v273_v53 = vadd.f32 %v569_v1, %v251_v46 }
  0x20   : > { %v274_v54 = vadd.f32 %v569_v1, %v252_v47  ;;  %v254_v55 = vmul.f32 %v559_v0, %v232_v43  ;;  %v285_v56 = vmax.f32 %v269_v48, 0.0  ;;  %v286_v57 = vmax.f32 %v270_v49, 0.0 }
  0x21   : > { %v287_v58 = vmax.f32 %v271_v50, 0.0  ;;  %v275_v59 = vadd.f32 %v569_v1, %v253_v51  ;;  %v288_v60 = vmax.f32 %v272_v52, 0.0  ;;  %v289_v61 = vmax.f32 %v273_v53, 0.0 }
  0x22   : > { %v290_v62 = vmax.f32 %v274_v54, 0.0  ;;  %v276_v63 = vadd.f32 %v569_v1, %v254_v55  ;;  %302 = vst.msk [vmem:[%s592_s6 + $0x40] sm:$0xff] %vm293_vm0, %v285_v56  ;;  %303 = vst.msk [vmem:[%s592_s6 + $0x48] sm:$0xff] %vm293_vm0, %v286_v57 }
  0x23   : > { %304 = vst.msk [vmem:[%s592_s6 + $0x50] sm:$0xff] %vm293_vm0, %v287_v58  ;;  %v291_v2 = vmax.f32 %v275_v59, 0.0  ;;  %305 = vst.msk [vmem:[%s592_s6 + $0x58] sm:$0xff] %vm293_vm0, %v288_v60 }
  0x24   : > { %306 = vst.msk [vmem:[%s592_s6 + $0x60] sm:$0xff] %vm293_vm0, %v289_v61  ;;  %307 = vst.msk [vmem:[%s592_s6 + $0x68] sm:$0xff] %vm293_vm0, %v290_v62  ;;  %v292_v0 = vmax.f32 %v276_v63, 0.0 }
  0x25   : > { %308 = vst.msk [vmem:[%s592_s6 + $0x70] sm:$0xff] %vm293_vm0, %v291_v2 }
  0x26   : > { %309 = vst.msk [vmem:[%s592_s6 + $0x78] sm:$0xff] %vm293_vm0, %v292_v0 }
  0x27 PF: > { %s13_s16 = sadd.s32 1, %s504_s16   ;;  %s675_s12 = smov %s496_s14 }
  0x28   : > { %p10_p7 = scmp.ge.s32.totalorder %s13_s16, 6   ;;  %s676_s13 = smov %s500_s15 }
  0x29   : > { %s677_s14 = smov %s680_s17  ;;  %s678_s15 = smov %s684_s18 }
  0x2a   :  { %12 = sbr.rel (!%p10_p7) target bundleno = 3 (0x3), region = 62 }

// kernel: _lambda_.3
= control target key start
LH: loop header
LB: loop body
LE: loop exit
PB: predicated region body
PF: predicated region fallthrough
CT: control target
= control target key end

     0   :  { %s1733_s23 = smov 0   ;;  %s1735_s1 = smov 0   ;;  %s2294_s0 = inlined_call_operand.vmem [shape: f32[1,4], index: 0, kind: input, shape index: {}]   ;;  %s2295_s1 = inlined_call_operand.vmem [shape: f32[1,4], index: 1, kind: input, shape index: {}]   ;;  %s2296_s2 = inlined_call_operand.vmem [shape: f32[2,16,16,4], index: 2, kind: input, shape index: {}, may-alias: {2,3,4}]   ;;  %s2297_s3 = inlined_call_operand.vmem [shape: f32[2,16,16,4], index: 3, kind: input, shape index: {}, may-alias: {2,3,4}]   ;;  %s2298_s4 = inlined_call_operand.vmem [shape: f32[2,16,16,4], index: 4, kind: input, shape index: {}, may-alias: {2,3,4}]   ;;  %s2299_s5 = inlined_call_operand.vmem [shape: bf16[36,8], index: 5, kind: input, shape index: {}]   ;;  %s2300_s6 = inlined_call_operand.vmem [shape: f32[2,16,16,8], index: 6, kind: output, shape index: {0}]   ;;  %s2301_s7 = inlined_call_operand.vmem [shape: f32[2,2,2,8], index: 7, kind: output, shape index: {1}]  }
   0x1   :  { %s1737_s24 = smov 0   ;;  %s1739_s25 = smov 0  }
   0x2   :  { %s1741_s26 = smov 0  }
   0x3 LB: > { %s27_s27 = sadd.s32 1, %s1675_s24  ;;  %s30_s28 = sadd.s32 1, %s1679_s25  ;;  %s1683_s26 = sphi %s1741_s26, %s18_s26   ;;  %s1679_s25 = sphi %s1739_s25, %s2308_s25   ;;  %s1675_s24 = sphi %s1737_s24, %s2307_s24   ;;  %s1671_s1 = sphi %s1735_s1, %s2306_s1   ;;  %s1667_s23 = sphi %s1733_s23, %s2305_s23  }
   0x4   : > { %p28_p0 = scmp.ge.s32.totalorder %s27_s27, 2  ;;  %p1504_p1 = scmp.ge.s32.totalorder %s1683_s26, 1 }
   0x5   : > { %p328_p2 = scmp.lt.s32.totalorder %s1683_s26, 5 }
   0x6   : > { %s2310_s27 = smov (%p28_p0, %s27_s27), 0  ;;  %s2312_s28 = smov (!%p28_p0, %s30_s28), %s1679_s25 }
   0x7   : > { %p329_p3 = pnand %p1504_p1, %p328_p2  ;;  %p32_p4 = scmp.ge.s32.totalorder %s2312_s28, 2 }
   0x8   : > { %s1766_s29 = sshll.u32 (!%p329_p3), %s1667_s23, 3  ;;  %p405_p5 = scmp.lt.s32.totalorder (!%p329_p3), %s1671_s1, 1  ;;  %vm599_vm0 = vcmask (!%p329_p3), 1040384   ;;  %vm600_vm1 = vsmask.f32 (!%p329_p3), 256  ;;  %vm751_vm3 = vcmask (!%p329_p3), 1046528  }
   0x9   : > { %s2314_s28 = smov (%p32_p4, %s2312_s28), 0  ;;  %332 = sbr.rel (%p329_p3) target bundleno = 513 (0x201), region = 44 }
   0xa   : > { %p407_p6 = scmp.lt.s32.totalorder (!%p329_p3), %s1766_s29, 15  ;;  %s1510_s15 = sadd.s32 (!%p329_p3), 4294967295, %s1766_s29  ;;  %vm1798_vm2 = vmand (!%p329_p3), %vm599_vm0, %vm600_vm1  ;;  %vm622_vm4 = vsmask.f32 (!%p329_p3), 7424  ;;  %vm1095_vm5 = vcmask (!%p329_p3), 1041408   ;;  %vm922_vm6 = vcmask (!%p329_p3), 31744  }
   0xb   : > { %p417_p7 = scmp.gt.s32.totalorder (!%p329_p3), %s1510_s15, 0  ;;  %p1511_p8 = scmp.lt.s32.totalorder (!%p329_p3), %s1510_s15, 15  ;;  %vm939_vm7 = vcmask (!%p329_p3), 64512   ;;  %vm956_vm8 = vcmask (!%p329_p3), 97280   ;;  %vm973_vm9 = vcmask (!%p329_p3), 130048   ;;  %vm990_vm10 = vcmask (!%p329_p3), 162816  }
   0xc   : > { %p489_p9 = scmp.gt.s32.totalorder (!%p329_p3), %s1667_s23, 0  ;;  %s1552_s18 = sadd.s32 (!%p329_p3), 8, %s1766_s29  ;;  %vm1007_vm11 = vcmask (!%p329_p3), 195584   ;;  %vm1024_vm12 = vcmask (!%p329_p3), 228352   ;;  %vm1041_vm13 = vcmask (!%p329_p3), 261120   ;;  %vm1078_vm14 = vcmask (!%p329_p3), 293888  }
   0xd   : > { %p1808_p10 = scmp.lt.s32.totalorder (!%p329_p3), %s1552_s18, 15  ;;  %p462_p11 = scmp.lt.s32.totalorder (!%p329_p3), %s1667_s23, 1  ;;  %vm1304_vm15 = vcmask (!%p329_p3), 58368  }
   0xe   : > { %s1685_s0 = smov (!%p329_p3), 12  }
  0x10   : > { %s2316_s1 = smov (!%p405_p5, %s1671_s1), 1  ;;  %s2320_s18 = smov (!%p1808_p10, %s1552_s18), 15 }
  0x11   : > { %s408_s30 = scalar_select %p407_p6, %s1766_s29, 15 }
  0x12   : > { %s1773_s8 = sshll.u32 %s2316_s1, 5  ;;  %s1530_s13 = sshll.u32 %s2316_s1, 1 }
  0x13   : > { %s1506_s9 = sshll.u32 %s408_s30, 1  ;;  %s2322_s18 = smov (!%p1808_p10, %s2320_s18), 15 }
  0x14   : > { %s1776_s10 = sadd.s32 %s1773_s8, %s1506_s9  ;;  %s1688_s1 = smov 20  }
  0x15   : > { %s1508_s11 = sshll.u32 %s1776_s10, 3 }
  0x16   : > { %s1784_s14 = scalar_lea.vmem %s2296_s2, %s1508_s11 }
  0x17   : > { %v471_v0 = vld [vmem:[%s1784_s14 + $0x10] sm:$0xff]  ;;  %v472_v1 = vld [vmem:[%s1784_s14 + $0x18] sm:$0xff]  ;;  %v469_v2 = vld [vmem:[%s1784_s14] sm:$0xff]  ;;  %s418_s16 = scalar_select %p417_p7, %s1510_s15, 0 }
  0x18   : > { %v500_v3 = vpack.c.bf16 %v472_v1, %v471_v0  ;;  %v470_v4 = vld [vmem:[%s1784_s14 + $0x8] sm:$0xff]  ;;  %v473_v5 = vld [vmem:[%s1784_s14 + $0x20] sm:$0xff]  ;;  %s1794_s17 = scalar_select %p489_p9, 1.0, 0.0  ;;  %v475_v27 = vld [vmem:[%s1784_s14 + $0x30] sm:$0xff] }
  0x19   : > { %v474_v6 = vld [vmem:[%s1784_s14 + $0x28] sm:$0xff]  ;;  %v499_v7 = vpack.c.bf16 %v470_v4, %v469_v2  ;;  %s2318_s16 = smov (!%p1511_p8, %s418_s16), 15  ;;  %v476_v28 = vld [vmem:[%s1784_s14 + $0x38] sm:$0xff]  ;;  %v479_v46 = vld [vmem:[%s1784_s14 + $0x50] sm:$0xff] }
  0x1a   : > { %v501_v8 = vpack.c.bf16 %v474_v6, %v473_v5  ;;  %v524_v9 = vshrl.u32 %v500_v3, 16  ;;  %v527_v10 = vshll.u32 %v500_v3, 16  ;;  %s1516_s19 = sshll.u32 %s2318_s16, 1  ;;  %v491_v26 = vstv %s1794_s17  ;;  %s1686_s16 = smov 24   ;;  %v480_v47 = vld [vmem:[%s1784_s14 + $0x58] sm:$0xff] }
  0x1b   : > { %v517_v11 = vshrl.u32 %v499_v7, 16  ;;  %v520_v12 = vshll.u32 %v499_v7, 16  ;;  %s425_s20 = sadd.s32 %s1516_s19, %s1773_s8  ;;  %v502_v41 = vpack.c.bf16 %v476_v28, %v475_v27  ;;  %s1869_s17 = sshll.u32 %s2322_s18, 1  ;;  %v504_v57 = vpack.c.bf16 %v480_v47, %v479_v46 }
  0x1c   : > { %v531_v13 = vshrl.u32 %v501_v8, 16  ;;  %v534_v14 = vshll.u32 %v501_v8, 16  ;;  %v526_v15 = vrot.slane %v524_v9, 7  ;;  %s1518_s22 = sshll.u32 %s425_s20, 3  ;;  %s442_s19 = sadd.s32 %s1869_s17, %s1773_s8  ;;  %v1642_v9 = vld [vmem:[%s2299_s5] sm:$0xff]  }
  0x1d   : > { %v519_v17 = vrot.slane %v517_v11, 7  ;;  %s427_s12 = scalar_lea.vmem %s2297_s3, %s1518_s22  ;;  %v538_v56 = vshrl.u32 %v502_v41, 16  ;;  %s1687_s20 = smov 8   ;;  %v541_v4 = vshll.u32 %v502_v41, 16  ;;  %v552_v5 = vshrl.u32 %v504_v57, 16  ;;  %1564 = vmatprep.subr.bf16.mxu0 %v1642_v9  ;;  %1586 = vmatprep.subr.bf16.mxu1 %v1642_v9 }
  0x1e   : > { %v533_v18 = vrot.slane %v531_v13, 7  ;;  %v529_v19 = vor.u32 %v527_v10, %v526_v15  ;;  %v614_v25 = vsel %vm1798_vm2, %v526_v15, 0  ;;  %v485_v33 = vld [vmem:[%s427_s12] sm:$0xff]  ;;  %v486_v34 = vld [vmem:[%s427_s12 + $0x8] sm:$0xff]  ;;  %s463_s15 = scalar_select %p462_p11, %s1667_s23, 1  ;;  %1565 = vmatpush3.bf16.msra.mxu0 %v1642_v9  ;;  %1589 = vmatpush3.bf16.msra.mxu1 %v1642_v9 }
  0x1f   : > { %v522_v20 = vor.u32 %v520_v12, %v519_v17  ;;  %v613_v22 = vsel %vm1798_vm2, %v519_v17, 0  ;;  %v759_v38 = vrot.slane %v614_v25, 1  ;;  %v655_v40 = vshll.u32 %v614_v25, 16  ;;  %s1689_s22 = smov 4   ;;  %v477_v13 = vld [vmem:[%s1784_s14 + $0x40] sm:$0xff]  ;;  %s1690_s12 = smov 16  }
  0x20   : > { %v536_v21 = vor.u32 %v534_v14, %v533_v18  ;;  %v1814_v23 = vsel %vm1798_vm2, 0, %v529_v19  ;;  %v756_v31 = vrot.slane %v613_v22, 1  ;;  %v643_v36 = vshll.u32 %v613_v22, 16  ;;  %s1867_s29 = sadd.s32 %s1530_s13, %s463_s15  ;;  %v478_v14 = vld [vmem:[%s1784_s14 + $0x48] sm:$0xff]  ;;  %v481_v19 = vld [vmem:[%s1784_s14 + $0x60] sm:$0xff]  ;;  %s1525_s13 = sshll.u32 %s442_s19, 3 }
  0x21   : > { %795 = vrot.lane.b32.xlu1 %v1814_v23, %s1685_s0  ;;  %v1821_v24 = vsel %vm1798_vm2, 0, %v522_v20  ;;  %v650_v37 = vshll.u32 %v1814_v23, 16  ;;  %v758_v42 = vrot.slane %v1814_v23, 1  ;;  %v492_v44 = vmul.f32 %v491_v26, %v485_v33  ;;  %v482_v20 = vld [vmem:[%s1784_s14 + $0x68] sm:$0xff]  ;;  %s1934_s8 = scalar_select %p462_p11, 1.0, 0.0 }
  0x22   : > { %793 = vrot.lane.b32.xlu0 %v1821_v24, %s1685_s0  ;;  %v1836_v29 = vsel %vm1798_vm2, 0, %v536_v21  ;;  %v755_v30 = vrot.slane %v1821_v24, 1  ;;  %v638_v32 = vshll.u32 %v1821_v24, 16  ;;  %v636_v35 = vshrl.u32 %v1821_v24, 16  ;;  %v1643_v21 = vld [vmem:[%s2299_s5 + $0x8] sm:$0xff]   ;;  %s1691_s15 = smov 28   ;;  %s444_s23 = scalar_lea.vmem %s2298_s4, %s1525_s13 }
  0x23   : > { %v662_v43 = vshll.u32 %v1836_v29, 16  ;;  %v493_v45 = vmul.f32 %v491_v26, %v486_v34  ;;  %v648_v49 = vshrl.u32 %v1814_v23, 16  ;;  %v652_v50 = vrot.slane %v650_v37, 1  ;;  %1566 = vmatprep.subr.bf16.mxu0 %v1643_v21  ;;  %1587 = vmatprep.subr.bf16.mxu1 %v1643_v21  ;;  %s1692_s19 = smov 32   ;;  %s1531_s10 = sshll.u32 %s1867_s29, 1 }
  0x24   : > { %v640_v39 = vrot.slane %v638_v32, 1  ;;  %v757_v48 = vsel %vm751_vm3, %v755_v30, %v756_v31  ;;  %v1863_v51 = vsel %vm1798_vm2, %v533_v18, 0  ;;  %v645_v53 = vrot.slane %v643_v36, 1  ;;  %v483_v36 = vld [vmem:[%s1784_s14 + $0x70] sm:$0xff]  ;;  %1567 = vmatpush3.bf16.msra.mxu0 %v1643_v21  ;;  %1590 = vmatpush3.bf16.msra.mxu1 %v1643_v21 }
  0x25   : > { %860 = vrot.lane.b32.xlu1 %v1836_v29, %s1686_s16  ;;  %v507_v54 = vpack.c.bf16 %v493_v45, %v492_v44  ;;  %v660_v55 = vshrl.u32 %v1836_v29, 16  ;;  %v664_v58 = vrot.slane %v662_v43, 1  ;;  %v667_v59 = vshll.u32 %v1863_v51, 16 }
  0x26   : > { %858 = vrot.lane.b32.xlu0 %v1814_v23, %s1686_s16  ;;  %v641_v52 = vor.u32 %v640_v39, %v636_v35  ;;  %v1878_v62 = vsel %vm751_vm3, %v758_v42, %v759_v38  ;;  %v653_v63 = vor.u32 %v652_v50, %v648_v49  ;;  %v657_v0 = vrot.slane %v655_v40, 1  ;;  %v484_v40 = vld [vmem:[%s1784_s14 + $0x78] sm:$0xff] }
  0x27   : > { %v510_v60 = vshrl.u32 %v507_v54, 16  ;;  %v513_v61 = vshll.u32 %v507_v54, 16  ;;  %v1881_v3 = vrot.slane %v538_v56, 7  ;;  %v665_v6 = vor.u32 %v664_v58, %v660_v55  ;;  %v487_v55 = vld [vmem:[%s444_s23] sm:$0xff]  ;;  %v488_v56 = vld [vmem:[%s444_s23 + $0x8] sm:$0xff] }
  0x28   : > { %v646_v1 = vsel %vm622_vm4, %v641_v52, %v645_v53  ;;  %v669_v7 = vrot.slane %v667_v59, 1  ;;  %v1890_v10 = vsel %vm622_vm4, %v653_v63, %v657_v0  ;;  %v554_v15 = vrot.slane %v552_v5, 7 }
  0x29   : > { %778 = vrot.lane.b32.xlu1 %v757_v48, %s1687_s20  ;;  %v512_v2 = vrot.slane %v510_v60, 7  ;;  %v543_v18 = vor.u32 %v541_v4, %v1881_v3  ;;  %v555_v26 = vshll.u32 %v504_v57, 16  ;;  %v1918_v32 = vpack.c.bf16 %v478_v14, %v477_v13 }
  0x2a   : > { %841 = vrot.lane.b32.xlu0 %v757_v48, %s1688_s1  ;;  %v1910_v22 = vsel %vm622_vm4, %v665_v6, %v669_v7  ;;  %v1922_v34 = vsel %vm1798_vm2, %v554_v15, 0  ;;  %v505_v35 = vpack.c.bf16 %v482_v20, %v481_v19  ;;  %v761_v37 = vrot.slane %v1836_v29, 1 }
  0x2b   : > { %v515_v8 = vor.u32 %v513_v61, %v512_v2  ;;  %v612_v11 = vsel %vm1798_vm2, %v512_v2, 0  ;;  %v557_v33 = vor.u32 %v555_v26, %v554_v15  ;;  %v762_v38 = vrot.slane %v1863_v51, 1 }
  0x2c   : > { %v753_v25 = vrot.slane %v612_v11, 1  ;;  %v631_v31 = vshll.u32 %v612_v11, 16  ;;  %v1929_v39 = vsel %vm1798_vm2, 0, %v543_v18  ;;  %v771_v42 = vrot.slane %v1922_v34, 1 }
  0x2d   : > { %843 = vrot.lane.b32.xlu1 %v1878_v62, %s1688_s1  ;;  %v1896_v12 = vsel %vm1798_vm2, 0, %v515_v8  ;;  %v1940_v41 = vsel %vm1798_vm2, 0, %v557_v33  ;;  %v559_v43 = vshrl.u32 %v505_v35, 16  ;;  %v562_v44 = vshll.u32 %v505_v35, 16 }
  0x2e   : > { %721 = vrot.lane.b32.xlu0 %v646_v1, %s1689_s22  ;;  %v626_v17 = vshll.u32 %v1896_v12, 16  ;;  %v752_v27 = vrot.slane %v1896_v12, 1  ;;  %v624_v28 = vshrl.u32 %v1896_v12, 16  ;;  %v633_v47 = vrot.slane %v631_v31, 1 }
  0x2f   : > { %v545_v48 = vshrl.u32 %v1918_v32, 16  ;;  %v770_v49 = vrot.slane %v1940_v41, 1  ;;  %v561_v50 = vrot.slane %v559_v43, 7  ;;  %v506_v51 = vpack.c.bf16 %v484_v40, %v483_v36  ;;  %v1644_v43 = vld [vmem:[%s2299_s5 + $0x10] ss:$0 sps:$4 sm:$0x33]  }
  0x30   : > { %v628_v30 = vrot.slane %v626_v17, 1  ;;  %v754_v45 = vsel %vm751_vm3, %v752_v27, %v753_v25  ;;  %v1952_v52 = vsel %vm751_vm3, %v761_v37, %v762_v38  ;;  %v1957_v53 = vsel %vm1798_vm2, %v1881_v3, 0  ;;  %1592 = vmatprep.subr.msk.bf16.mxu0 %vm1095_vm5, %v1644_v43  ;;  %1593 = vmatprep.subr.msk.bf16.mxu1 %vm1095_vm5, %v1644_v43 }
  0x31   : > { %823 = vrot.lane.b32.xlu1 %v1890_v10, %s1690_s12  ;;  %v674_v54 = vshll.u32 %v1929_v39, 16  ;;  %v496_v57 = vstv %s1934_s8  ;;  %v1963_v58 = vsel %vm751_vm3, %v770_v49, %v771_v42  ;;  %v564_v59 = vor.u32 %v562_v44, %v561_v50 }
  0x32   : > { %821 = vrot.lane.b32.xlu0 %v646_v1, %s1690_s12  ;;  %v629_v46 = vor.u32 %v628_v30, %v624_v28  ;;  %v619_v60 = vsel %vm1798_vm2, %v561_v50, 0  ;;  %v566_v61 = vshrl.u32 %v506_v51, 16  ;;  %v569_v2 = vshll.u32 %v506_v51, 16 }
  0x33   : > { %v715_v0 = vshll.u32 %v619_v60, 16  ;;  %v774_v1 = vrot.slane %v619_v60, 1  ;;  %v1972_v3 = vsel %vm1798_vm2, 0, %v564_v59  ;;  %v497_v5 = vmul.f32 %v496_v57, %v487_v55 }
  0x34   : > { %v634_v63 = vsel %vm622_vm4, %v629_v46, %v633_v47  ;;  %v568_v4 = vrot.slane %v566_v61, 7  ;;  %v498_v6 = vmul.f32 %v496_v57, %v488_v56  ;;  %v1974_v7 = vrot.slane %v545_v48, 7 }
  0x35   : > { %888 = vrot.lane.b32.xlu1 %v1910_v22, %s1691_s15  ;;  %v548_v8 = vshll.u32 %v1918_v32, 16  ;;  %v708_v9 = vshrl.u32 %v1972_v3, 16  ;;  %v710_v11 = vshll.u32 %v1972_v3, 16  ;;  %v773_v13 = vrot.slane %v1972_v3, 1 }
  0x36   : > { %886 = vrot.lane.b32.xlu0 %v1890_v10, %s1691_s15  ;;  %v571_v14 = vor.u32 %v569_v2, %v568_v4  ;;  %v620_v15 = vsel %vm1798_vm2, %v568_v4, 0  ;;  %v508_v17 = vpack.c.bf16 %v498_v6, %v497_v5  ;;  %v717_v19 = vrot.slane %v715_v0, 1 }
  0x37   : > { %v712_v18 = vrot.slane %v710_v11, 1  ;;  %v817_v20 = vshll.u32 %v620_v15, 16  ;;  %v839_v21 = vrot.slane %v620_v15, 1  ;;  %v1986_v25 = vsel %vm751_vm3, %v773_v13, %v774_v1 }
  0x38   : > { %v1990_v26 = vsel %vm1798_vm2, 0, %v571_v14  ;;  %v576_v27 = vshll.u32 %v508_v17, 16  ;;  %v672_v32 = vshrl.u32 %v1929_v39, 16  ;;  %v679_v33 = vshll.u32 %v1957_v53, 16 }
  0x39   : > { %776 = vrot.lane.b32.xlu1 %v754_v45, %s1687_s20  ;;  %v713_v28 = vor.u32 %v712_v18, %v708_v9  ;;  %v810_v30 = vshrl.u32 %v1990_v26, 16  ;;  %v812_v31 = vshll.u32 %v1990_v26, 16  ;;  %v838_v35 = vrot.slane %v1990_v26, 1 }
  0x3a   : > { %906 = vrot.lane.b32.xlu0 %v1878_v62, %s1692_s19  ;;  %v676_v37 = vrot.slane %v674_v54, 1  ;;  %v819_v42 = vrot.slane %v817_v20, 1  ;;  %v550_v44 = vor.u32 %v548_v8, %v1974_v7  ;;  %v681_v50 = vrot.slane %v679_v33, 1 }
  0x3b   : > { %v2002_v38 = vsel %vm622_vm4, %v713_v28, %v717_v19  ;;  %v814_v40 = vrot.slane %v812_v31, 1  ;;  %v2009_v45 = vsel %vm751_vm3, %v838_v35, %v839_v21  ;;  %v765_v5 = vrot.slane %v1957_v53, 1 }
  0x3c   : > { %v677_v55 = vor.u32 %v676_v37, %v672_v32  ;;  %v2028_v60 = vsel %vm1798_vm2, 0, %v550_v44  ;;  %v617_v9 = vsel %vm1798_vm2, %v1974_v7, 0  ;;  %v696_v20 = vshrl.u32 %v1940_v41, 16 }
  0x3d   : > { %723 = vrot.lane.b32.xlu1 %v1890_v10, %s1689_s22  ;;  %v573_v10 = vshrl.u32 %v508_v17, 16  ;;  %v815_v48 = vor.u32 %v814_v40, %v810_v30  ;;  %v686_v6 = vshll.u32 %v2028_v60, 16  ;;  %v684_v14 = vshrl.u32 %v2028_v60, 16 }
  0x3e   : > { %719 = vrot.lane.b32.xlu0 %v634_v63, %s1689_s22  ;;  %v1097_v63 = vsel %vm1095_vm5, %v1644_v43, 0  ;;  %v682_v4 = vsel %vm622_vm4, %v677_v55, %v681_v50  ;;  %v691_v53 = vshll.u32 %v617_v9, 16  ;;  %v767_v17 = vrot.slane %v2028_v60, 1 }
  0x3f   : > { %v575_v36 = vrot.slane %v573_v10, 7  ;;  %v2022_v56 = vsel %vm622_vm4, %v815_v48, %v819_v42  ;;  %1569 = vmatpush3.bf16.msra.mxu0 %v1097_v63  ;;  %1591 = vmatpush3.bf16.msra.mxu1 %v1097_v63  ;;  %v688_v15 = vrot.slane %v686_v6, 1  ;;  %v768_v18 = vrot.slane %v617_v9, 1 }
  0x40   : > { %v693_v7 = vrot.slane %v691_v53, 1  ;;  %v703_v10 = vshll.u32 %v1922_v34, 16 }
  0x41   : > { %725 = vrot.lane.b32.xlu1 %v1910_v22, %s1689_s22  ;;  %v578_v46 = vor.u32 %v576_v27, %v575_v36  ;;  %v621_v47 = vsel %vm1798_vm2, %v575_v36, 0  ;;  %v689_v16 = vor.u32 %v688_v15, %v684_v14  ;;  %v769_v19 = vsel %vm751_vm3, %v767_v17, %v768_v18 }
  0x42   : > { %908 = vrot.lane.b32.xlu0 %v1952_v52, %s1692_s19  ;;  %v882_v49 = vshll.u32 %v621_v47, 16  ;;  %v904_v54 = vrot.slane %v621_v47, 1  ;;  %v705_v28 = vrot.slane %v703_v10, 1 }
  0x43   : > { %v2017_v51 = vsel %vm1798_vm2, 0, %v578_v46 }
  0x44   : > { %v875_v57 = vshrl.u32 %v2017_v51, 16  ;;  %v877_v59 = vshll.u32 %v2017_v51, 16  ;;  %v903_v61 = vrot.slane %v2017_v51, 1  ;;  %v884_v1 = vrot.slane %v882_v49, 1 }
  0x45   : > { %782 = vrot.lane.b32.xlu1 %v1952_v52, %s1687_s20 }
  0x46   : > { %780 = vrot.lane.b32.xlu0 %v1878_v62, %s1687_s20  ;;  %v879_v0 = vrot.slane %v877_v59, 1  ;;  %v764_v62 = vrot.slane %v1929_v39, 1  ;;  %v2035_v2 = vsel %vm751_vm3, %v903_v61, %v904_v54 }
  0x48   : > { %v880_v8 = vor.u32 %v879_v0, %v875_v57  ;;  %v766_v13 = vsel %vm751_vm3, %v764_v62, %v765_v5 }
  0x49   : > { %799 = vrot.lane.b32.xlu1 %v1929_v39, %s1685_s0 }
  0x4a   : > { %797 = vrot.lane.b32.xlu0 %v1836_v29, %s1685_s0  ;;  %v885_v11 = vsel %vm622_vm4, %v880_v8, %v884_v1 }
  0x4d   : > { %827 = vrot.lane.b32.xlu1 %v682_v4, %s1690_s12 }
  0x4e   : > { %825 = vrot.lane.b32.xlu0 %v1910_v22, %s1690_s12  ;;  %v694_v22 = vsel %vm622_vm4, %v689_v16, %v693_v7 }
  0x51   : > { %847 = vrot.lane.b32.xlu1 %v766_v13, %s1688_s1 }
  0x52   : > { %845 = vrot.lane.b32.xlu0 %v1952_v52, %s1688_s1  ;;  %v698_v52 = vshll.u32 %v1940_v41, 16 }
  0x54   : > { %v700_v21 = vrot.slane %v698_v52, 1 }
  0x55   : > { %864 = vrot.lane.b32.xlu1 %v2028_v60, %s1686_s16 }
  0x56   : > { %862 = vrot.lane.b32.xlu0 %v1929_v39, %s1686_s16  ;;  %v701_v27 = vor.u32 %v700_v21, %v696_v20 }
  0x58   : > { %v706_v30 = vsel %vm622_vm4, %v701_v27, %v705_v28 }
  0x59   : > { %892 = vrot.lane.b32.xlu1 %v694_v22, %s1691_s15 }
  0x5a   : > { %890 = vrot.lane.b32.xlu0 %v682_v4, %s1691_s15 }
  0x5d   : > { %727 = vrot.lane.b32.xlu1 %v682_v4, %s1689_s22 }
  0x5e   : > { %910 = vrot.lane.b32.xlu0 %v766_v13, %s1692_s19 }
  0x61   : > { %729 = vrot.lane.b32.xlu1 %v694_v22, %s1689_s22 }
  0x62   : > { %912 = vrot.lane.b32.xlu0 %v769_v19, %s1692_s19 }
  0x65   : > { %786 = vrot.lane.b32.xlu1 %v769_v19, %s1687_s20 }
  0x66   : > { %784 = vrot.lane.b32.xlu0 %v766_v13, %s1687_s20 }
  0x69   : > { %803 = vrot.lane.b32.xlu1 %v1940_v41, %s1685_s0 }
  0x6a   : > { %801 = vrot.lane.b32.xlu0 %v2028_v60, %s1685_s0 }
  0x6d   : > { %831 = vrot.lane.b32.xlu1 %v706_v30, %s1690_s12 }
  0x6e   : > { %829 = vrot.lane.b32.xlu0 %v694_v22, %s1690_s12 }
  0x71   : > { %851 = vrot.lane.b32.xlu1 %v1963_v58, %s1688_s1 }
  0x72   : > { %849 = vrot.lane.b32.xlu0 %v769_v19, %s1688_s1 }
  0x75   : > { %868 = vrot.lane.b32.xlu1 %v1972_v3, %s1686_s16 }
  0x76   : > { %866 = vrot.lane.b32.xlu0 %v1940_v41, %s1686_s16 }
  0x79   : > { %896 = vrot.lane.b32.xlu1 %v2002_v38, %s1691_s15 }
  0x7a   : > { %894 = vrot.lane.b32.xlu0 %v706_v30, %s1691_s15 }
  0x7d   : > { %731 = vrot.lane.b32.xlu1 %v706_v30, %s1689_s22 }
  0x7e   : > { %914 = vrot.lane.b32.xlu0 %v1963_v58, %s1692_s19 }
  0x81   : > { %733 = vrot.lane.b32.xlu1 %v2002_v38, %s1689_s22  ;;  %s467_s22 = scalar_lea.vmem %s2301_s7, %s1531_s10 }
  0x82   : > { %916 = vrot.lane.b32.xlu0 %v1986_v25, %s1692_s19 }
  0x85   : > { %790 = vrot.lane.b32.xlu1 %v1986_v25, %s1687_s20 }
  0x86   : > { %788 = vrot.lane.b32.xlu0 %v1963_v58, %s1687_s20  ;;  %s2208_s20 = scalar_lea.vmem %s2300_s6, %s1508_s11 }
  0x89   : > { %807 = vrot.lane.b32.xlu1 %v1990_v26, %s1685_s0 }
  0x8a   : > { %805 = vrot.lane.b32.xlu0 %v1972_v3, %s1685_s0 }
  0x8d   : > { %835 = vrot.lane.b32.xlu1 %v2022_v56, %s1690_s12 }
  0x8e   : > { %833 = vrot.lane.b32.xlu0 %v2002_v38, %s1690_s12 }
  0x91   : > { %855 = vrot.lane.b32.xlu1 %v2009_v45, %s1688_s1 }
  0x92   : > { %853 = vrot.lane.b32.xlu0 %v1986_v25, %s1688_s1 }
  0x93   : > { %v796_v34 = vpop.permute.xlu1 %795 }
  0x94   : > { %v794_v58 = vpop.permute.xlu0 %793 }
  0x95   : > { %872 = vrot.lane.b32.xlu1 %v2017_v51, %s1686_s16 }
  0x96   : > { %870 = vrot.lane.b32.xlu0 %v1990_v26, %s1686_s16 }
  0x97   : > { %v861_v31 = vpop.permute.xlu1 %860 }
  0x98   : > { %v859_v32 = vpop.permute.xlu0 %858 }
  0x99   : > { %900 = vrot.lane.b32.xlu1 %v885_v11, %s1691_s15 }
  0x9a   : > { %898 = vrot.lane.b32.xlu0 %v2022_v56, %s1691_s15 }
  0x9b   : > { %v779_v33 = vpop.permute.xlu1 %778 }
  0x9c   : > { %v842_v35 = vpop.permute.xlu0 %841 }
  0x9d   : > { %920 = vrot.lane.b32.xlu1 %v2035_v2, %s1692_s19 }
  0x9e   : > { %918 = vrot.lane.b32.xlu0 %v2009_v45, %s1692_s19 }
  0x9f   : > { %v844_v25 = vpop.permute.xlu1 %843 }
  0xa0   : > { %v722_v36 = vpop.permute.xlu0 %721 }
  0xa1   : > { %v926_v38 = vsel %vm922_vm6, %v1821_v24, %v722_v36 }
  0xa2   : > { %v943_v43 = vsel %vm939_vm7, %v926_v38, %v779_v33 }
  0xa3   : > { %v824_v37 = vpop.permute.xlu1 %823  ;;  %v960_v46 = vsel %vm956_vm8, %v943_v43, %v796_v34 }
  0xa4   : > { %v822_v26 = vpop.permute.xlu0 %821  ;;  %v977_v45 = vsel %vm973_vm9, %v960_v46, %v824_v37 }
  0xa5   : > { %v994_v24 = vsel %vm990_vm10, %v977_v45, %v844_v25 }
  0xa6   : > { %v1011_v59 = vsel %vm1007_vm11, %v994_v24, %v861_v31 }
  0xa7   : > { %v889_v40 = vpop.permute.xlu1 %888 }
  0xa8   : > { %v887_v42 = vpop.permute.xlu0 %886  ;;  %v1028_v1 = vsel %vm1024_vm12, %v1011_v59, %v889_v40 }
  0xab   : > { %v777_v44 = vpop.permute.xlu1 %776 }
  0xac   : > { %v907_v47 = vpop.permute.xlu0 %906 }
  0xaf   : > { %v724_v48 = vpop.permute.xlu1 %723 }
  0xb0   : > { %v720_v49 = vpop.permute.xlu0 %719  ;;  %v928_v53 = vsel %vm922_vm6, %v1814_v23, %v724_v48 }
  0xb1   : > { %v924_v50 = vsel %vm922_vm6, %v1896_v12, %v720_v49 }
  0xb2   : > { %v941_v51 = vsel %vm939_vm7, %v924_v50, %v777_v44 }
  0xb3   : > { %v958_v54 = vsel %vm956_vm8, %v941_v51, %v794_v58  ;;  %v726_v55 = vpop.permute.xlu1 %725 }
  0xb4   : > { %v975_v56 = vsel %vm973_vm9, %v958_v54, %v822_v26  ;;  %v909_v57 = vpop.permute.xlu0 %908  ;;  %v930_v52 = vsel %vm922_vm6, %v1836_v29, %v726_v55 }
  0xb5   : > { %v992_v61 = vsel %vm990_vm10, %v975_v56, %v842_v35  ;;  %v1045_v4 = vsel %vm1041_vm13, %v1028_v1, %v909_v57 }
  0xb6   : > { %v1009_v63 = vsel %vm1007_vm11, %v992_v61, %v859_v32 }
  0xb7   : > { %v783_v12 = vpop.permute.xlu1 %782  ;;  %v1026_v0 = vsel %vm1024_vm12, %v1009_v63, %v887_v42 }
  0xb8   : > { %v781_v62 = vpop.permute.xlu0 %780  ;;  %v1043_v2 = vsel %vm1041_vm13, %v1026_v0, %v907_v47  ;;  %v947_v20 = vsel %vm939_vm7, %v930_v52, %v783_v12 }
  0xb9   : > { %1570 = vmatprep.mubr.msk.bf16.mxu0 %vm1078_vm14, %v1043_v2  ;;  %v945_v16 = vsel %vm939_vm7, %v928_v53, %v781_v62 }
  0xba   : > { %1571 = vmatmul.mubr.msk.bf16.vlgmr.msra.gmra.mrb[0].mxu0 %vm1078_vm14, %v1045_v4 }
  0xbb   : > { %v800_v5 = vpop.permute.xlu1 %799 }
  0xbc   : > { %v798_v6 = vpop.permute.xlu0 %797  ;;  %v964_v23 = vsel %vm956_vm8, %v947_v20, %v800_v5 }
  0xbd   : > { %v962_v22 = vsel %vm956_vm8, %v945_v16, %v798_v6 }
  0xbf   : > { %v828_v8 = vpop.permute.xlu1 %827 }
  0xc0   : > { %v826_v9 = vpop.permute.xlu0 %825  ;;  %v981_v30 = vsel %vm973_vm9, %v964_v23, %v828_v8 }
  0xc1   : > { %v979_v18 = vsel %vm973_vm9, %v962_v22, %v826_v9 }
  0xc3   : > { %v848_v11 = vpop.permute.xlu1 %847 }
  0xc4   : > { %v846_v13 = vpop.permute.xlu0 %845  ;;  %v998_v58 = vsel %vm990_vm10, %v981_v30, %v848_v11 }
  0xc5   : > { %v996_v19 = vsel %vm990_vm10, %v979_v18, %v846_v13 }
  0xc7   : > { %v865_v14 = vpop.permute.xlu1 %864 }
  0xc8   : > { %v863_v15 = vpop.permute.xlu0 %862  ;;  %v1015_v29 = vsel %vm1007_vm11, %v998_v58, %v865_v14 }
  0xc9   : > { %v1013_v21 = vsel %vm1007_vm11, %v996_v19, %v863_v15 }
  0xcb   : > { %v893_v7 = vpop.permute.xlu1 %892 }
  0xcc   : > { %v891_v17 = vpop.permute.xlu0 %890  ;;  %v1032_v32 = vsel %vm1024_vm12, %v1015_v29, %v893_v7 }
  0xcd   : > { %v1030_v27 = vsel %vm1024_vm12, %v1013_v21, %v891_v17 }
  0xcf   : > { %v728_v10 = vpop.permute.xlu1 %727 }
  0xd0   : > { %v911_v28 = vpop.permute.xlu0 %910  ;;  %v932_v47 = vsel %vm922_vm6, %v1929_v39, %v728_v10 }
  0xd1   : > { %v1047_v34 = vsel %vm1041_vm13, %v1030_v27, %v911_v28 }
  0xd2   : > { %1574 = vmatprep.mubr.msk.bf16.mxu0 %vm1078_vm14, %v1047_v34 }
  0xd3   : > { %v730_v31 = vpop.permute.xlu1 %729 }
  0xd4   : > { %v913_v33 = vpop.permute.xlu0 %912  ;;  %v934_v51 = vsel %vm922_vm6, %v2028_v60, %v730_v31 }
  0xd5   : > { %v1049_v35 = vsel %vm1041_vm13, %v1032_v32, %v913_v33 }
  0xd6   : > { %1575 = vmatmul.mubr.msk.bf16.gmra.mrb[4].mxu0 %vm1078_vm14, %v1049_v35 }
  0xd7   : > { %v787_v25 = vpop.permute.xlu1 %786 }
  0xd8   : > { %v785_v36 = vpop.permute.xlu0 %784  ;;  %v951_v55 = vsel %vm939_vm7, %v934_v51, %v787_v25 }
  0xd9   : > { %v949_v45 = vsel %vm939_vm7, %v932_v47, %v785_v36 }
  0xdb   : > { %v804_v37 = vpop.permute.xlu1 %803 }
  0xdc   : > { %v802_v26 = vpop.permute.xlu0 %801  ;;  %v968_v39 = vsel %vm956_vm8, %v951_v55, %v804_v37 }
  0xdd   : > { %v966_v49 = vsel %vm956_vm8, %v949_v45, %v802_v26 }
  0xdf   : > { %v832_v38 = vpop.permute.xlu1 %831 }
  0xe0   : > { %v830_v40 = vpop.permute.xlu0 %829  ;;  %v985_v63 = vsel %vm973_vm9, %v968_v39, %v832_v38 }
  0xe1   : > { %v983_v24 = vsel %vm973_vm9, %v966_v49, %v830_v40 }
  0xe3   : > { %v852_v42 = vpop.permute.xlu1 %851 }
  0xe4   : > { %v850_v43 = vpop.permute.xlu0 %849  ;;  %v1002_v0 = vsel %vm990_vm10, %v985_v63, %v852_v42 }
  0xe5   : > { %v1000_v54 = vsel %vm990_vm10, %v983_v24, %v850_v43 }
  0xe7   : > { %v869_v44 = vpop.permute.xlu1 %868 }
  0xe8   : > { %v867_v46 = vpop.permute.xlu0 %866  ;;  %v1019_v60 = vsel %vm1007_vm11, %v1002_v0, %v869_v44 }
  0xe9   : > { %v1017_v56 = vsel %vm1007_vm11, %v1000_v54, %v867_v46 }
  0xeb   : > { %v897_v48 = vpop.permute.xlu1 %896 }
  0xec   : > { %v895_v50 = vpop.permute.xlu0 %894  ;;  %v1036_v62 = vsel %vm1024_vm12, %v1019_v60, %v897_v48 }
  0xed   : > { %v1034_v59 = vsel %vm1024_vm12, %v1017_v56, %v895_v50 }
  0xef   : > { %v732_v57 = vpop.permute.xlu1 %731 }
  0xf0   : > { %v915_v61 = vpop.permute.xlu0 %914  ;;  %v936_v22 = vsel %vm922_vm6, %v1940_v41, %v732_v57 }
  0xf1   : > { %v1051_v12 = vsel %vm1041_vm13, %v1034_v59, %v915_v61 }
  0xf2   : > { %1578 = vmatprep.mubr.msk.bf16.mxu1 %vm1078_vm14, %v1051_v12 }
  0xf3   : > { %v734_v1 = vpop.permute.xlu1 %733 }
  0xf4   : > { %v917_v2 = vpop.permute.xlu0 %916  ;;  %v938_v7 = vsel %vm922_vm6, %v1972_v3, %v734_v1 }
  0xf5   : > { %v1053_v4 = vsel %vm1041_vm13, %v1036_v62, %v917_v2 }
  0xf6   : > { %1579 = vmatmul.mubr.msk.bf16.vlgmr.msra.gmra.mrb[0].mxu1 %vm1078_vm14, %v1053_v4 }
  0xf7   : > { %v791_v5 = vpop.permute.xlu1 %790 }
  0xf8   : > { %v789_v6 = vpop.permute.xlu0 %788  ;;  %v955_v17 = vsel %vm939_vm7, %v938_v7, %v791_v5 }
  0xf9   : > { %v953_v18 = vsel %vm939_vm7, %v936_v22, %v789_v6 }
  0xfb   : > { %v808_v8 = vpop.permute.xlu1 %807 }
  0xfc   : > { %v806_v9 = vpop.permute.xlu0 %805  ;;  %v972_v52 = vsel %vm956_vm8, %v955_v17, %v808_v8 }
  0xfd   : > { %v970_v20 = vsel %vm956_vm8, %v953_v18, %v806_v9 }
  0xff   : > { %v836_v11 = vpop.permute.xlu1 %835 }
 0x100   : > { %v834_v13 = vpop.permute.xlu0 %833  ;;  %v989_v21 = vsel %vm973_vm9, %v972_v52, %v836_v11 }
 0x101   : > { %v987_v23 = vsel %vm973_vm9, %v970_v20, %v834_v13 }
 0x103   : > { %v856_v14 = vpop.permute.xlu1 %855 }
 0x104   : > { %v854_v15 = vpop.permute.xlu0 %853  ;;  %v1006_v3 = vsel %vm990_vm10, %v989_v21, %v856_v14 }
 0x105   : > { %v1004_v27 = vsel %vm990_vm10, %v987_v23, %v854_v15 }
 0x107   : > { %v873_v53 = vpop.permute.xlu1 %872 }
 0x108   : > { %v871_v16 = vpop.permute.xlu0 %870  ;;  %v1023_v41 = vsel %vm1007_vm11, %v1006_v3, %v873_v53 }
 0x109   : > { %v1021_v28 = vsel %vm1007_vm11, %v1004_v27, %v871_v16 }
 0x10b   : > { %v901_v19 = vpop.permute.xlu1 %900 }
 0x10c   : > { %v899_v10 = vpop.permute.xlu0 %898  ;;  %v1040_v30 = vsel %vm1024_vm12, %v1023_v41, %v901_v19 }
 0x10d   : > { %v1038_v58 = vsel %vm1024_vm12, %v1021_v28, %v899_v10 }
 0x10f   : > { %v921_v34 = vpop.permute.xlu1 %920 }
 0x110   : > { %v1057_v29 = vsel %vm1041_vm13, %v1040_v30, %v921_v34  ;;  %v919_v31 = vpop.permute.xlu0 %918 }
 0x111   : > { %v1055_v32 = vsel %vm1041_vm13, %v1038_v58, %v919_v31 }
 0x112   : > { %1582 = vmatprep.mubr.msk.bf16.mxu1 %vm1078_vm14, %v1055_v32 }
 0x113   : > { %1583 = vmatmul.mubr.msk.bf16.gmra.mrb[4].mxu1 %vm1078_vm14, %v1057_v29 }
 0x18d   : > { %v1572_v33 = vpop.f32.mrb[0].mxu0 }
 0x18e   : > { %1198 = vst.msk [vmem:[%s2208_s20 + $0x10] sm:$0xff] %vm939_vm7, %v1572_v33  ;;  %v1133_v35 = vpop.f32.mrb[1].mxu0  ;;  %v1251_v26 = vmul.f32 %v1572_v33, %v1572_v33  ;;  %v1215_v44 = vsel %vm939_vm7, %v1572_v33, 0.0 }
 0x18f   : > { %1196 = vst.msk [vmem:[%s2208_s20] sm:$0xff] %vm939_vm7, %v1133_v35  ;;  %v1249_v25 = vmul.f32 %v1133_v35, %v1133_v35  ;;  %v1573_v36 = vpop.f32.mrb[2].mxu0  ;;  %v1212_v38 = vsel %vm939_vm7, %v1133_v35, 0.0 }
 0x190   : > { %1199 = vst.msk [vmem:[%s2208_s20 + $0x18] sm:$0xff] %vm939_vm7, %v1573_v36  ;;  %v1136_v37 = vpop.f32.mrb[3].mxu0  ;;  %v1252_v47 = vmul.f32 %v1573_v36, %v1573_v36  ;;  %v1268_v50 = vsel %vm939_vm7, %v1251_v26, 0.0  ;;  %v1217_v24 = vsel %vm939_vm7, %v1573_v36, 0.0 }
 0x191   : > { %1197 = vst.msk [vmem:[%s2208_s20 + $0x8] sm:$0xff] %vm939_vm7, %v1136_v37  ;;  %v1213_v40 = vsel %vm939_vm7, %v1136_v37, 0.0  ;;  %v1250_v42 = vmul.f32 %v1136_v37, %v1136_v37  ;;  %v1265_v46 = vsel %vm939_vm7, %v1249_v25, 0.0 }
 0x192   : > { %v1214_v43 = vadd.f32 %v1213_v40, %v1212_v38  ;;  %v1270_v55 = vsel %vm939_vm7, %v1252_v47, 0.0 }
 0x193   : > { %v1266_v45 = vsel %vm939_vm7, %v1250_v42, 0.0 }
 0x194   : > { %v1216_v48 = vadd.f32 %v1215_v44, %v1214_v43  ;;  %v1267_v49 = vadd.f32 %v1266_v45, %v1265_v46 }
 0x196   : > { %v1269_v51 = vadd.f32 %v1268_v50, %v1267_v49  ;;  %v1218_v54 = vadd.f32 %v1217_v24, %v1216_v48 }
 0x198   : > { %v1271_v56 = vadd.f32 %v1270_v55, %v1269_v51 }
 0x1a9   : > { %v1576_v57 = vpop.f32.mrb[4].mxu0 }
 0x1aa   : > { %1202 = vst.msk [vmem:[%s2208_s20 + $0x30] sm:$0xff] %vm939_vm7, %v1576_v57  ;;  %v1149_v39 = vpop.f32.mrb[5].mxu0  ;;  %v1255_v60 = vmul.f32 %v1576_v57, %v1576_v57  ;;  %v1223_v6 = vsel %vm939_vm7, %v1576_v57, 0.0 }
 0x1ab   : > { %1200 = vst.msk [vmem:[%s2208_s20 + $0x20] sm:$0xff] %vm939_vm7, %v1149_v39  ;;  %v1219_v59 = vsel %vm939_vm7, %v1149_v39, 0.0  ;;  %v1253_v61 = vmul.f32 %v1149_v39, %v1149_v39  ;;  %v1577_v63 = vpop.f32.mrb[6].mxu0 }
 0x1ac   : > { %v1220_v12 = vadd.f32 %v1219_v59, %v1218_v54  ;;  %1203 = vst.msk [vmem:[%s2208_s20 + $0x38] sm:$0xff] %vm939_vm7, %v1577_v63  ;;  %v1152_v0 = vpop.f32.mrb[7].mxu0  ;;  %v1256_v8 = vmul.f32 %v1577_v63, %v1577_v63  ;;  %v1276_v14 = vsel %vm939_vm7, %v1255_v60, 0.0  ;;  %v1225_v15 = vsel %vm939_vm7, %v1577_v63, 0.0 }
 0x1ad   : > { %v1272_v1 = vsel %vm939_vm7, %v1253_v61, 0.0  ;;  %1201 = vst.msk [vmem:[%s2208_s20 + $0x28] sm:$0xff] %vm939_vm7, %v1152_v0  ;;  %v1221_v62 = vsel %vm939_vm7, %v1152_v0, 0.0  ;;  %v1254_v2 = vmul.f32 %v1152_v0, %v1152_v0 }
 0x1ae   : > { %v1273_v4 = vadd.f32 %v1272_v1, %v1271_v56  ;;  %v1222_v5 = vadd.f32 %v1221_v62, %v1220_v12  ;;  %v1278_v7 = vsel %vm939_vm7, %v1256_v8, 0.0 }
 0x1af   : > { %v1274_v9 = vsel %vm939_vm7, %v1254_v2, 0.0 }
 0x1b0   : > { %v1224_v11 = vadd.f32 %v1223_v6, %v1222_v5  ;;  %v1275_v13 = vadd.f32 %v1274_v9, %v1273_v4 }
 0x1b2   : > { %v1277_v53 = vadd.f32 %v1276_v14, %v1275_v13  ;;  %v1226_v16 = vadd.f32 %v1225_v15, %v1224_v11 }
 0x1b4   : > { %v1279_v22 = vadd.f32 %v1278_v7, %v1277_v53 }
 0x1c9   : > { %v1580_v17 = vpop.f32.mrb[0].mxu1 }
 0x1ca   : > { %1206 = vst.msk [vmem:[%s2208_s20 + $0x50] sm:$0xff] %vm939_vm7, %v1580_v17  ;;  %v1165_v18 = vpop.f32.mrb[1].mxu1  ;;  %v1259_v23 = vmul.f32 %v1580_v17, %v1580_v17  ;;  %v1231_v34 = vsel %vm939_vm7, %v1580_v17, 0.0 }
 0x1cb   : > { %1204 = vst.msk [vmem:[%s2208_s20 + $0x40] sm:$0xff] %vm939_vm7, %v1165_v18  ;;  %v1227_v52 = vsel %vm939_vm7, %v1165_v18, 0.0  ;;  %v1257_v19 = vmul.f32 %v1165_v18, %v1165_v18  ;;  %v1581_v20 = vpop.f32.mrb[2].mxu1 }
 0x1cc   : > { %v1228_v21 = vadd.f32 %v1227_v52, %v1226_v16  ;;  %1207 = vst.msk [vmem:[%s2208_s20 + $0x58] sm:$0xff] %vm939_vm7, %v1581_v20  ;;  %v1168_v10 = vpop.f32.mrb[3].mxu1  ;;  %v1260_v58 = vmul.f32 %v1581_v20, %v1581_v20  ;;  %v1284_v33 = vsel %vm939_vm7, %v1259_v23, 0.0  ;;  %v1233_v35 = vsel %vm939_vm7, %v1581_v20, 0.0 }
 0x1cd   : > { %v1280_v3 = vsel %vm939_vm7, %v1257_v19, 0.0  ;;  %1205 = vst.msk [vmem:[%s2208_s20 + $0x48] sm:$0xff] %vm939_vm7, %v1168_v10  ;;  %v1229_v27 = vsel %vm939_vm7, %v1168_v10, 0.0  ;;  %v1258_v41 = vmul.f32 %v1168_v10, %v1168_v10 }
 0x1ce   : > { %v1281_v28 = vadd.f32 %v1280_v3, %v1279_v22  ;;  %v1230_v30 = vadd.f32 %v1229_v27, %v1228_v21  ;;  %v1286_v37 = vsel %vm939_vm7, %v1260_v58, 0.0 }
 0x1cf   : > { %v1282_v29 = vsel %vm939_vm7, %v1258_v41, 0.0 }
 0x1d0   : > { %v1232_v31 = vadd.f32 %v1231_v34, %v1230_v30  ;;  %v1283_v32 = vadd.f32 %v1282_v29, %v1281_v28 }
 0x1d2   : > { %v1285_v25 = vadd.f32 %v1284_v33, %v1283_v32  ;;  %v1234_v36 = vadd.f32 %v1233_v35, %v1232_v31 }
 0x1d4   : > { %v1287_v26 = vadd.f32 %v1286_v37, %v1285_v25 }
 0x1e6   : > { %v1584_v38 = vpop.f32.mrb[4].mxu1 }
 0x1e7   : > { %1210 = vst.msk [vmem:[%s2208_s20 + $0x70] sm:$0xff] %vm939_vm7, %v1584_v38  ;;  %v1181_v40 = vpop.f32.mrb[5].mxu1  ;;  %v1263_v45 = vmul.f32 %v1584_v38, %v1584_v38  ;;  %v1239_v54 = vsel %vm939_vm7, %v1584_v38, 0.0 }
 0x1e8   : > { %1208 = vst.msk [vmem:[%s2208_s20 + $0x60] sm:$0xff] %vm939_vm7, %v1181_v40  ;;  %v1235_v42 = vsel %vm939_vm7, %v1181_v40, 0.0  ;;  %v1261_v43 = vmul.f32 %v1181_v40, %v1181_v40  ;;  %v1585_v44 = vpop.f32.mrb[6].mxu1 }
 0x1e9   : > { %v1236_v46 = vadd.f32 %v1235_v42, %v1234_v36  ;;  %1211 = vst.msk [vmem:[%s2208_s20 + $0x78] sm:$0xff] %vm939_vm7, %v1585_v44  ;;  %v1184_v47 = vpop.f32.mrb[7].mxu1  ;;  %v1264_v55 = vmul.f32 %v1585_v44, %v1585_v44  ;;  %v1292_v59 = vsel %vm939_vm7, %v1263_v45, 0.0  ;;  %v1241_v61 = vsel %vm939_vm7, %v1585_v44, 0.0 }
 0x1ea   : > { %v1288_v48 = vsel %vm939_vm7, %v1261_v43, 0.0  ;;  %1209 = vst.msk [vmem:[%s2208_s20 + $0x68] sm:$0xff] %vm939_vm7, %v1184_v47  ;;  %v1237_v49 = vsel %vm939_vm7, %v1184_v47, 0.0  ;;  %v1262_v50 = vmul.f32 %v1184_v47, %v1184_v47 }
 0x1eb   : > { %v1289_v24 = vadd.f32 %v1288_v48, %v1287_v26  ;;  %v1238_v51 = vadd.f32 %v1237_v49, %v1236_v46  ;;  %v1294_v0 = vsel %vm939_vm7, %v1264_v55, 0.0 }
 0x1ec   : > { %v1290_v56 = vsel %vm939_vm7, %v1262_v50, 0.0 }
 0x1ed   : > { %v1240_v57 = vadd.f32 %v1239_v54, %v1238_v51  ;;  %v1291_v39 = vadd.f32 %v1290_v56, %v1289_v24 }
 0x1ef   : > { %v1242_v63 = vadd.f32 %v1241_v61, %v1240_v57  ;;  %v1293_v12 = vadd.f32 %v1292_v59, %v1291_v39 }
 0x1f1   : > { %v1243_v60 = vrot.slane %v1242_v63, 4  ;;  %v1295_v1 = vadd.f32 %v1294_v0, %v1293_v12 }
 0x1f3   : > { %v1244_v62 = vadd.f32 %v1243_v60, %v1242_v63  ;;  %v1296_v2 = vrot.slane %v1295_v1, 4 }
 0x1f5   : > { %v1245_v4 = vrot.slane %v1244_v62, 2  ;;  %v1297_v5 = vadd.f32 %v1296_v2, %v1295_v1 }
 0x1f7   : > { %v1246_v6 = vadd.f32 %v1245_v4, %v1244_v62  ;;  %v1298_v8 = vrot.slane %v1297_v5, 2 }
 0x1f9   : > { %v1247_v9 = vrot.slane %v1246_v6, 1  ;;  %v1299_v11 = vadd.f32 %v1298_v8, %v1297_v5 }
 0x1fb   : > { %v1300_v13 = vrot.slane %v1299_v11, 1  ;;  %v1248_v14 = vadd.f32 %v1247_v9, %v1246_v6 }
 0x1fd   : > { %v1301_v15 = vadd.f32 %v1300_v13, %v1299_v11 }
 0x1ff   : > { %v1303_v53 = vsel %vm599_vm0, %v1248_v14, %v1301_v15 }
 0x200   : > { %1305 = vst.msk [vmem:[%s467_s22] sm:$0x3] %vm1304_vm15, %v1303_v53 }
 0x201 PF: > { %s18_s26 = sadd.s32 1, %s1683_s26   ;;  %s2305_s23 = smov %s1675_s24 }
 0x202   : > { %p15_p12 = scmp.ge.s32.totalorder %s18_s26, 6   ;;  %s2306_s1 = smov %s1679_s25 }
 0x203   : > { %s2307_s24 = smov %s2310_s27  ;;  %s2308_s25 = smov %s2314_s28 }
 0x204   :  { %17 = sbr.rel (!%p15_p12) target bundleno = 3 (0x3), region = 92 }

// kernel: _lambda_.4
= control target key start
LH: loop header
LB: loop body
LE: loop exit
PB: predicated region body
PF: predicated region fallthrough
CT: control target
= control target key end

     0   :  { %s1839_s24 = smov 0   ;;  %s1841_s25 = smov 0   ;;  %s2458_s0 = inlined_call_operand.vmem [shape: f32[1,8], index: 0, kind: input, shape index: {}]   ;;  %s2459_s1 = inlined_call_operand.vmem [shape: f32[1,8], index: 1, kind: input, shape index: {}]   ;;  %s2460_s2 = inlined_call_operand.vmem [shape: f32[2,16,16,8], index: 2, kind: input, shape index: {}, may-alias: {2,3,4}]   ;;  %s2461_s3 = inlined_call_operand.vmem [shape: f32[2,16,16,8], index: 3, kind: input, shape index: {}, may-alias: {2,3,4}]   ;;  %s2462_s4 = inlined_call_operand.vmem [shape: f32[2,16,16,8], index: 4, kind: input, shape index: {}, may-alias: {2,3,4}]   ;;  %s2463_s5 = inlined_call_operand.vmem [shape: bf16[72,8], index: 5, kind: input, shape index: {}]   ;;  %s2464_s6 = inlined_call_operand.vmem [shape: f32[2,16,16,8], index: 6, kind: output, shape index: {0}]   ;;  %s2465_s7 = inlined_call_operand.vmem [shape: f32[2,2,2,8], index: 7, kind: output, shape index: {1}]  }
   0x1   :  { %s1843_s26 = smov 0   ;;  %s1845_s27 = smov 0  }
   0x2   :  { %s1847_s28 = smov 0  }
   0x3 LB: > { %s27_s29 = sadd.s32 1, %s1781_s26  ;;  %s30_s30 = sadd.s32 1, %s1785_s27  ;;  %s1789_s28 = sphi %s1847_s28, %s18_s28   ;;  %s1785_s27 = sphi %s1845_s27, %s2474_s27   ;;  %s1781_s26 = sphi %s1843_s26, %s2473_s26   ;;  %s1777_s25 = sphi %s1841_s25, %s2472_s25   ;;  %s1773_s24 = sphi %s1839_s24, %s2471_s24  }
   0x4   : > { %p28_p0 = scmp.ge.s32.totalorder %s27_s29, 2  ;;  %p1594_p1 = scmp.ge.s32.totalorder %s1789_s28, 1 }
   0x5   : > { %p328_p2 = scmp.lt.s32.totalorder %s1789_s28, 5 }
   0x6   : > { %s2476_s29 = smov (%p28_p0, %s27_s29), 0  ;;  %s2478_s30 = smov (!%p28_p0, %s30_s30), %s1785_s27 }
   0x7   : > { %p329_p3 = pnand %p1594_p1, %p328_p2  ;;  %p32_p4 = scmp.ge.s32.totalorder %s2478_s30, 2 }
   0x8   : > { %s1872_s8 = sshll.u32 (!%p329_p3), %s1773_s24, 3  ;;  %p405_p5 = scmp.lt.s32.totalorder (!%p329_p3), %s1777_s25, 1  ;;  %v1888_v0 = vld [vmem:[%s2458_s0] ss:$0 sm:$0xff] (!%p329_p3)  ;;  %vm673_vm0 = vcmask (!%p329_p3), 1040384   ;;  %vm825_vm3 = vcmask (!%p329_p3), 1046528  }
   0x9   : > { %s2480_s30 = smov (%p32_p4, %s2478_s30), 0  ;;  %332 = sbr.rel (%p329_p3) target bundleno = 519 (0x207), region = 44 }
   0xa   : > { %p407_p6 = scmp.lt.s32.totalorder (!%p329_p3), %s1872_s8, 15  ;;  %v1900_v1 = vld [vmem:[%s2459_s1] ss:$0 sm:$0xff] (!%p329_p3)  ;;  %s1600_s21 = sadd.s32 (!%p329_p3), 4294967295, %s1872_s8  ;;  %vm674_vm1 = vsmask.f32 (!%p329_p3), 256 }
   0xb   : > { %p417_p7 = scmp.gt.s32.totalorder (!%p329_p3), %s1600_s21, 0  ;;  %p1601_p8 = scmp.lt.s32.totalorder (!%p329_p3), %s1600_s21, 15  ;;  %vm1950_vm2 = vmand (!%p329_p3), %vm673_vm0, %vm674_vm1  ;;  %vm696_vm4 = vsmask.f32 (!%p329_p3), 7424  ;;  %vm1185_vm5 = vcmask (!%p329_p3), 1043456   ;;  %vm996_vm6 = vcmask (!%p329_p3), 64512  }
   0xc   : > { %p563_p9 = scmp.gt.s32.totalorder (!%p329_p3), %s1773_s24, 0  ;;  %s1646_s23 = sadd.s32 (!%p329_p3), 8, %s1872_s8  ;;  %vm1013_vm7 = vcmask (!%p329_p3), 130048   ;;  %vm1030_vm8 = vcmask (!%p329_p3), 195584   ;;  %vm1047_vm9 = vcmask (!%p329_p3), 261120   ;;  %vm1064_vm10 = vcmask (!%p329_p3), 326656  }
   0xd   : > { %p1936_p10 = scmp.lt.s32.totalorder (!%p329_p3), %s1646_s23, 15  ;;  %p462_p11 = scmp.lt.s32.totalorder (!%p329_p3), %s1773_s24, 1  ;;  %vm1081_vm11 = vcmask (!%p329_p3), 392192   ;;  %vm1098_vm12 = vcmask (!%p329_p3), 457728   ;;  %vm1115_vm13 = vcmask (!%p329_p3), 523264   ;;  %vm1168_vm14 = vcmask (!%p329_p3), 588800  }
   0xe   : > { %s1795_s19 = smov (!%p329_p3), 64   ;;  %vm1394_vm15 = vcmask (!%p329_p3), 58368  }
  0x10   : > { %s2482_s25 = smov (!%p405_p5, %s1777_s25), 1  ;;  %s2486_s23 = smov (!%p1936_p10, %s1646_s23), 15 }
  0x11   : > { %s408_s9 = scalar_select %p407_p6, %s1872_s8, 15 }
  0x12   : > { %s1879_s10 = sshll.u32 %s2482_s25, 5  ;;  %s2488_s23 = smov (!%p1936_p10, %s2486_s23), 15 }
  0x13   : > { %s1596_s11 = sshll.u32 %s408_s9, 1 }
  0x14   : > { %s1882_s12 = sadd.s32 %s1879_s10, %s1596_s11 }
  0x15   : > { %s2466_s13 = sshll.u32 %s1882_s12, 3 }
  0x16   : > { %s1895_s18 = scalar_lea.vmem %s2460_s2, %s2466_s13  ;;  %s1798_s13 = smov 8  }
  0x17   : > { %v471_v2 = vld [vmem:[%s1895_s18 + $0x10] sm:$0xff]  ;;  %v472_v3 = vld [vmem:[%s1895_s18 + $0x18] sm:$0xff]  ;;  %v469_v4 = vld [vmem:[%s1895_s18] sm:$0xff]  ;;  %s418_s22 = scalar_select %p417_p7, %s1600_s21, 0 }
  0x18   : > { %v499_v5 = vmul.f32 %v1888_v0, %v471_v2  ;;  %v500_v6 = vmul.f32 %v1888_v0, %v472_v3  ;;  %v470_v7 = vld [vmem:[%s1895_s18 + $0x8] sm:$0xff]  ;;  %v497_v8 = vmul.f32 %v1888_v0, %v469_v4  ;;  %v473_v9 = vld [vmem:[%s1895_s18 + $0x20] sm:$0xff]  ;;  %v475_v20 = vld [vmem:[%s1895_s18 + $0x30] sm:$0xff]  ;;  %s1929_s9 = scalar_select %p563_p9, 1.0, 0.0 }
  0x19   : > { %v474_v10 = vld [vmem:[%s1895_s18 + $0x28] sm:$0xff]  ;;  %v498_v11 = vmul.f32 %v1888_v0, %v470_v7  ;;  %v501_v12 = vmul.f32 %v1888_v0, %v473_v9  ;;  %v476_v21 = vld [vmem:[%s1895_s18 + $0x38] sm:$0xff]  ;;  %v479_v25 = vld [vmem:[%s1895_s18 + $0x50] sm:$0xff]  ;;  %s2484_s22 = smov (!%p1601_p8, %s418_s22), 15  ;;  %v503_v30 = vmul.f32 %v1888_v0, %v475_v20  ;;  %s1620_s21 = sshll.u32 %s2482_s25, 1 }
  0x1a   : > { %v502_v13 = vmul.f32 %v1888_v0, %v474_v10  ;;  %v521_v14 = vadd.f32 %v1900_v1, %v499_v5  ;;  %v522_v15 = vadd.f32 %v1900_v1, %v500_v6  ;;  %v519_v16 = vadd.f32 %v1900_v1, %v497_v8  ;;  %s1606_s11 = sshll.u32 %s2484_s22, 1  ;;  %v480_v37 = vld [vmem:[%s1895_s18 + $0x58] sm:$0xff]  ;;  %v477_v48 = vld [vmem:[%s1895_s18 + $0x40] sm:$0xff]  ;;  %v478_v60 = vld [vmem:[%s1895_s18 + $0x48] sm:$0xff]  ;;  %s1791_s22 = smov 24  }
  0x1b   : > { %v520_v17 = vadd.f32 %v1900_v1, %v498_v11  ;;  %v523_v18 = vadd.f32 %v1900_v1, %v501_v12  ;;  %v504_v31 = vmul.f32 %v1888_v0, %v476_v21  ;;  %v507_v34 = vmul.f32 %v1888_v0, %v479_v25  ;;  %s425_s15 = sadd.s32 %s1606_s11, %s1879_s10  ;;  %s1992_s11 = sshll.u32 %s2488_s23, 1 }
  0x1c   : > { %v524_v19 = vadd.f32 %v1900_v1, %v502_v13  ;;  %v537_v22 = vmax.f32 %v521_v14, 0.0  ;;  %v538_v23 = vmax.f32 %v522_v15, 0.0  ;;  %v535_v24 = vmax.f32 %v519_v16, 0.0  ;;  %s1608_s16 = sshll.u32 %s425_s15, 3  ;;  %s442_s14 = sadd.s32 %s1992_s11, %s1879_s10 }
  0x1d   : > { %v536_v26 = vmax.f32 %v520_v17, 0.0  ;;  %v539_v27 = vmax.f32 %v523_v18, 0.0  ;;  %s427_s20 = scalar_lea.vmem %s2461_s3, %s1608_s16  ;;  %v525_v43 = vadd.f32 %v1900_v1, %v503_v30  ;;  %v526_v44 = vadd.f32 %v1900_v1, %v504_v31  ;;  %s1792_s23 = smov 48  }
  0x1e   : > { %v540_v28 = vmax.f32 %v524_v19, 0.0  ;;  %v574_v29 = vpack.c.bf16 %v538_v23, %v537_v22  ;;  %v1956_v49 = vmul.f32 %v1888_v0, %v480_v37  ;;  %v1959_v50 = vadd.f32 %v1900_v1, %v507_v34  ;;  %v485_v52 = vld [vmem:[%s427_s20] sm:$0xff]  ;;  %v486_v53 = vld [vmem:[%s427_s20 + $0x8] sm:$0xff]  ;;  %s463_s25 = scalar_select %p462_p11, %s1773_s24, 1 }
  0x1f   : > { %v573_v32 = vpack.c.bf16 %v536_v26, %v535_v24  ;;  %v541_v58 = vmax.f32 %v525_v43, 0.0  ;;  %v542_v59 = vmax.f32 %v526_v44, 0.0  ;;  %v505_v61 = vmul.f32 %v1888_v0, %v477_v48  ;;  %s1794_s15 = smov 40   ;;  %v1746_v48 = vld [vmem:[%s2463_s5] sm:$0xff]   ;;  %s1615_s16 = sshll.u32 %s442_s14, 3 }
  0x20   : > { %v575_v33 = vpack.c.bf16 %v540_v28, %v539_v27  ;;  %v598_v35 = vshrl.u32 %v574_v29, 16  ;;  %v601_v36 = vshll.u32 %v574_v29, 16  ;;  %s1980_s8 = sadd.s32 %s1620_s21, %s463_s25  ;;  %v551_v2 = vmul.f32 %v1888_v0, %v485_v52  ;;  %1660 = vmatprep.subr.bf16.mxu0 %v1746_v48  ;;  %1686 = vmatprep.subr.bf16.mxu1 %v1746_v48  ;;  %s1796_s25 = smov 32  }
  0x21   : > { %v591_v38 = vshrl.u32 %v573_v32, 16  ;;  %v594_v39 = vshll.u32 %v573_v32, 16  ;;  %v552_v3 = vmul.f32 %v1888_v0, %v486_v53  ;;  %v565_v8 = vstv %s1929_s9  ;;  %s1793_s9 = smov 16   ;;  %1661 = vmatpush3.bf16.msra.mxu0 %v1746_v48  ;;  %1691 = vmatpush3.bf16.msra.mxu1 %v1746_v48  ;;  %s1797_s14 = smov 56  }
  0x22   : > { %v605_v40 = vshrl.u32 %v575_v33, 16  ;;  %v608_v41 = vshll.u32 %v575_v33, 16  ;;  %v600_v42 = vrot.slane %v598_v35, 7  ;;  %v506_v9 = vmul.f32 %v1888_v0, %v478_v60  ;;  %s2095_s21 = scalar_lea.vmem %s2462_s4, %s1615_s16 }
  0x23   : > { %v593_v46 = vrot.slane %v591_v38, 7  ;;  %v2015_v17 = vadd.f32 %v1900_v1, %v505_v61  ;;  %v553_v19 = vadd.f32 %v1900_v1, %v551_v2  ;;  %v554_v20 = vadd.f32 %v1900_v1, %v552_v3  ;;  %v481_v38 = vld [vmem:[%s1895_s18 + $0x60] sm:$0xff] }
  0x24   : > { %v607_v47 = vrot.slane %v605_v40, 7  ;;  %v603_v51 = vor.u32 %v601_v36, %v600_v42  ;;  %v688_v63 = vsel %vm1950_vm2, %v600_v42, 0  ;;  %v576_v21 = vpack.c.bf16 %v542_v59, %v541_v58 }
  0x25   : > { %v596_v54 = vor.u32 %v594_v39, %v593_v46  ;;  %v1970_v56 = vsel %vm1950_vm2, %v593_v46, 0  ;;  %v833_v11 = vrot.slane %v688_v63, 1  ;;  %v729_v13 = vshll.u32 %v688_v63, 16 }
  0x26   : > { %v610_v55 = vor.u32 %v608_v41, %v607_v47  ;;  %v1976_v57 = vsel %vm1950_vm2, 0, %v603_v51  ;;  %v830_v6 = vrot.slane %v1970_v56, 1  ;;  %v689_v12 = vsel %vm1950_vm2, %v607_v47, 0 }
  0x27   : > { %869 = vrot.lane.b32.xlu1 %v1976_v57, %s1791_s22  ;;  %v1986_v62 = vsel %vm1950_vm2, 0, %v596_v54  ;;  %v724_v7 = vshll.u32 %v1976_v57, 16  ;;  %v832_v10 = vrot.slane %v1976_v57, 1  ;;  %v722_v14 = vshrl.u32 %v1976_v57, 16 }
  0x28   : > { %867 = vrot.lane.b32.xlu0 %v1986_v62, %s1791_s22  ;;  %v1998_v4 = vsel %vm1950_vm2, 0, %v610_v55  ;;  %v829_v5 = vrot.slane %v1986_v62, 1  ;;  %v836_v23 = vrot.slane %v689_v12, 1  ;;  %v712_v24 = vshll.u32 %v1986_v62, 16 }
  0x29   : > { %v726_v15 = vrot.slane %v724_v7, 1  ;;  %v736_v16 = vshll.u32 %v1998_v4, 16  ;;  %v835_v22 = vrot.slane %v1998_v4, 1  ;;  %v2025_v25 = vadd.f32 %v1900_v1, %v506_v9 }
  0x2a   : > { %v831_v18 = vsel %vm825_vm3, %v829_v5, %v830_v6  ;;  %v2028_v26 = vsel %vm825_vm3, %v832_v10, %v833_v11  ;;  %v731_v27 = vrot.slane %v729_v13, 1  ;;  %v555_v28 = vmax.f32 %v553_v19, 0.0  ;;  %v1747_v6 = vld [vmem:[%s2463_s5 + $0x8] sm:$0xff]  }
  0x2b   : > { %934 = vrot.lane.b32.xlu1 %v1998_v4, %s1792_s23  ;;  %v556_v29 = vmax.f32 %v554_v20, 0.0  ;;  %v727_v30 = vor.u32 %v726_v15, %v722_v14  ;;  %v734_v31 = vshrl.u32 %v1998_v4, 16  ;;  %v738_v32 = vrot.slane %v736_v16, 1  ;;  %1662 = vmatprep.subr.bf16.mxu0 %v1747_v6  ;;  %v1748_v16 = vld [vmem:[%s2463_s5 + $0x10] sm:$0xff]  }
  0x2c   : > { %932 = vrot.lane.b32.xlu0 %v1976_v57, %s1792_s23  ;;  %v741_v33 = vshll.u32 %v689_v12, 16  ;;  %v566_v34 = vmul.f32 %v565_v8, %v555_v28  ;;  %v612_v36 = vshrl.u32 %v576_v21, 16  ;;  %v530_v37 = vadd.f32 %v1900_v1, %v1956_v49  ;;  %1663 = vmatpush3.bf16.msra.mxu0 %v1747_v6 }
  0x2d   : > { %v567_v35 = vmul.f32 %v565_v8, %v556_v29  ;;  %v710_v39 = vshrl.u32 %v1986_v62, 16  ;;  %v714_v40 = vrot.slane %v712_v24, 1  ;;  %v717_v41 = vshll.u32 %v1970_v56, 16  ;;  %1687 = vmatprep.subr.bf16.mxu1 %v1747_v6  ;;  %1664 = vmatprep.subr.bf16.mxu0 %v1748_v16 }
  0x2e   : > { %v545_v42 = vmax.f32 %v1959_v50, 0.0  ;;  %v2040_v43 = vsel %vm825_vm3, %v835_v22, %v836_v23  ;;  %v543_v46 = vmax.f32 %v2015_v17, 0.0  ;;  %v546_v47 = vmax.f32 %v530_v37, 0.0  ;;  %v482_v50 = vld [vmem:[%s1895_s18 + $0x68] sm:$0xff]  ;;  %1692 = vmatpush3.bf16.msra.mxu1 %v1747_v6 }
  0x2f   : > { %852 = vrot.lane.b32.xlu1 %v831_v18, %s1793_s9  ;;  %v581_v44 = vpack.c.bf16 %v567_v35, %v566_v34  ;;  %v2049_v49 = vsel %vm696_vm4, %v727_v30, %v731_v27  ;;  %v739_v51 = vor.u32 %v738_v32, %v734_v31  ;;  %v743_v52 = vrot.slane %v741_v33, 1  ;;  %v484_v27 = vld [vmem:[%s1895_s18 + $0x78] sm:$0xff]  ;;  %1688 = vmatprep.subr.bf16.mxu1 %v1748_v16  ;;  %v487_v32 = vld [vmem:[%s2095_s21] sm:$0xff] }
  0x30   : > { %915 = vrot.lane.b32.xlu0 %v831_v18, %s1794_s15  ;;  %v509_v53 = vmul.f32 %v1888_v0, %v481_v38  ;;  %v614_v56 = vrot.slane %v612_v36, 7  ;;  %v615_v58 = vshll.u32 %v576_v21, 16  ;;  %v715_v59 = vor.u32 %v714_v40, %v710_v39  ;;  %1665 = vmatpush3.bf16.msra.mxu0 %v1748_v16  ;;  %v1749_v33 = vld [vmem:[%s2463_s5 + $0x18] sm:$0xff]  }
  0x31   : > { %v584_v54 = vshrl.u32 %v581_v44, 16  ;;  %v587_v55 = vshll.u32 %v581_v44, 16  ;;  %v719_v60 = vrot.slane %v717_v41, 1  ;;  %v544_v61 = vmax.f32 %v2025_v25, 0.0  ;;  %v483_v25 = vld [vmem:[%s1895_s18 + $0x70] sm:$0xff]  ;;  %1666 = vmatprep.subr.bf16.mxu0 %v1749_v33 }
  0x32   : > { %v578_v63 = vpack.c.bf16 %v546_v47, %v545_v42  ;;  %v510_v3 = vmul.f32 %v1888_v0, %v482_v50  ;;  %v2058_v5 = vadd.f32 %v1900_v1, %v509_v53  ;;  %v2068_v7 = vsel %vm696_vm4, %v739_v51, %v743_v52  ;;  %1693 = vmatpush3.bf16.msra.mxu1 %v1748_v16  ;;  %v488_v42 = vld [vmem:[%s2095_s21 + $0x8] sm:$0xff]  ;;  %s2138_s18 = scalar_select %p462_p11, 1.0, 0.0  ;;  %v1750_v16 = vld [vmem:[%s2463_s5 + $0x20] ss:$0 sps:$4 sm:$0xff]  }
  0x33   : > { %917 = vrot.lane.b32.xlu1 %v2028_v26, %s1794_s15  ;;  %v586_v2 = vrot.slane %v584_v54, 7  ;;  %v617_v9 = vor.u32 %v615_v58, %v614_v56  ;;  %v720_v11 = vsel %vm696_vm4, %v715_v59, %v719_v60  ;;  %v2076_v12 = vsel %vm1950_vm2, %v614_v56, 0  ;;  %1689 = vmatprep.subr.bf16.mxu1 %v1749_v33 }
  0x34   : > { %980 = vrot.lane.b32.xlu0 %v2028_v26, %s1795_s19  ;;  %v626_v10 = vshrl.u32 %v578_v63, 16  ;;  %v2078_v13 = vpack.c.bf16 %v544_v61, %v543_v46  ;;  %v753_v19 = vshll.u32 %v2076_v12, 16  ;;  %v629_v23 = vshll.u32 %v578_v63, 16  ;;  %1667 = vmatpush3.bf16.msra.mxu0 %v1749_v33 }
  0x35   : > { %v589_v8 = vor.u32 %v587_v55, %v586_v2  ;;  %v686_v15 = vsel %vm1950_vm2, %v586_v2, 0  ;;  %v2100_v18 = vsel %vm1950_vm2, 0, %v617_v9  ;;  %v532_v24 = vadd.f32 %v1900_v1, %v510_v3  ;;  %1696 = vmatprep.subr.msk.bf16.mxu0 %vm1185_vm5, %v1750_v16 }
  0x36   : > { %v628_v20 = vrot.slane %v626_v10, 7  ;;  %v827_v21 = vrot.slane %v686_v15, 1  ;;  %v619_v22 = vshrl.u32 %v2078_v13, 16  ;;  %v705_v29 = vshll.u32 %v686_v15, 16  ;;  %1694 = vmatpush3.bf16.msra.mxu1 %v1749_v33 }
  0x37   : > { %897 = vrot.lane.b32.xlu1 %v2049_v49, %s1796_s25  ;;  %v2082_v14 = vsel %vm1950_vm2, 0, %v589_v8  ;;  %v547_v31 = vmax.f32 %v2058_v5, 0.0  ;;  %v622_v36 = vshll.u32 %v2078_v13, 16  ;;  %v548_v39 = vmax.f32 %v532_v24, 0.0  ;;  %1697 = vmatprep.subr.msk.bf16.mxu1 %vm1185_vm5, %v1750_v16 }
  0x38   : > { %982 = vrot.lane.b32.xlu0 %v2040_v43, %s1795_s19  ;;  %v700_v17 = vshll.u32 %v2082_v14, 16  ;;  %v826_v28 = vrot.slane %v2082_v14, 1  ;;  %v2110_v30 = vsel %vm1950_vm2, %v628_v20, 0  ;;  %v698_v34 = vshrl.u32 %v2082_v14, 16 }
  0x39   : > { %v631_v37 = vor.u32 %v629_v23, %v628_v20  ;;  %v845_v38 = vrot.slane %v2110_v30, 1  ;;  %v511_v40 = vmul.f32 %v1888_v0, %v483_v25  ;;  %v512_v41 = vmul.f32 %v1888_v0, %v484_v27 }
  0x3a   : > { %v702_v35 = vrot.slane %v700_v17, 1  ;;  %v748_v44 = vshll.u32 %v2100_v18, 16  ;;  %v2127_v46 = vrot.slane %v619_v22, 7  ;;  %v557_v48 = vmul.f32 %v1888_v0, %v487_v32 }
  0x3b   : > { %962 = vrot.lane.b32.xlu1 %v2068_v7, %s1797_s14  ;;  %v2131_v47 = vsel %vm1950_vm2, 0, %v631_v37  ;;  %v828_v51 = vsel %vm825_vm3, %v826_v28, %v827_v21  ;;  %v707_v52 = vrot.slane %v705_v29, 1  ;;  %v579_v53 = vpack.c.bf16 %v548_v39, %v547_v31 }
  0x3c   : > { %795 = vrot.lane.b32.xlu0 %v720_v11, %s1798_s13  ;;  %v844_v50 = vrot.slane %v2131_v47, 1  ;;  %v533_v54 = vadd.f32 %v1900_v1, %v511_v40  ;;  %v534_v55 = vadd.f32 %v1900_v1, %v512_v41  ;;  %v558_v56 = vmul.f32 %v1888_v0, %v488_v42 }
  0x3d   : > { %v559_v58 = vadd.f32 %v1900_v1, %v557_v48  ;;  %v703_v59 = vor.u32 %v702_v35, %v698_v34  ;;  %v633_v61 = vshrl.u32 %v579_v53, 16  ;;  %v636_v63 = vshll.u32 %v579_v53, 16 }
  0x3e   : > { %v2149_v60 = vsel %vm825_vm3, %v844_v50, %v845_v38  ;;  %v549_v2 = vmax.f32 %v533_v54, 0.0  ;;  %v550_v3 = vmax.f32 %v534_v55, 0.0  ;;  %v560_v5 = vadd.f32 %v1900_v1, %v558_v56 }
  0x3f   : > { %797 = vrot.lane.b32.xlu1 %v2049_v49, %s1798_s13  ;;  %v561_v6 = vmax.f32 %v559_v58, 0.0  ;;  %v746_v8 = vshrl.u32 %v2100_v18, 16  ;;  %v839_v0 = vrot.slane %v2076_v12, 1  ;;  %v635_v9 = vrot.slane %v633_v61, 7 }
  0x40   : > { %895 = vrot.lane.b32.xlu0 %v720_v11, %s1796_s25  ;;  %v570_v10 = vstv %s2138_s18  ;;  %v755_v11 = vrot.slane %v753_v19, 1  ;;  %v580_v13 = vpack.c.bf16 %v550_v3, %v549_v2  ;;  %v562_v15 = vmax.f32 %v560_v5, 0.0 }
  0x41   : > { %v624_v1 = vor.u32 %v622_v36, %v2127_v46  ;;  %v638_v17 = vor.u32 %v636_v63, %v635_v9  ;;  %v693_v12 = vsel %vm1950_vm2, %v635_v9, 0  ;;  %v571_v20 = vmul.f32 %v570_v10, %v561_v6 }
  0x42   : > { %v708_v21 = vsel %vm696_vm4, %v703_v59, %v707_v52  ;;  %v789_v22 = vshll.u32 %v693_v12, 16  ;;  %v848_v19 = vrot.slane %v693_v12, 1  ;;  %v640_v23 = vshrl.u32 %v580_v13, 16 }
  0x43   : > { %799 = vrot.lane.b32.xlu1 %v2068_v7, %s1798_s13  ;;  %v2167_v24 = vsel %vm1950_vm2, 0, %v638_v17  ;;  %v643_v25 = vshll.u32 %v580_v13, 16  ;;  %v572_v27 = vmul.f32 %v570_v10, %v562_v15  ;;  %v838_v32 = vrot.slane %v2100_v18, 1 }
  0x44   : > { %960 = vrot.lane.b32.xlu0 %v2049_v49, %s1797_s14  ;;  %v750_v49 = vrot.slane %v748_v44, 1  ;;  %v782_v28 = vshrl.u32 %v2167_v24, 16  ;;  %v784_v29 = vshll.u32 %v2167_v24, 16  ;;  %v847_v31 = vrot.slane %v2167_v24, 1 }
  0x45   : > { %v642_v33 = vrot.slane %v640_v23, 7  ;;  %v582_v34 = vpack.c.bf16 %v572_v27, %v571_v20  ;;  %v1187_v35 = vsel %vm1185_vm5, %v1750_v16, 0  ;;  %v2178_v36 = vsel %vm1950_vm2, 0, %v624_v1 }
  0x46   : > { %v786_v37 = vrot.slane %v784_v29, 1  ;;  %v791_v38 = vrot.slane %v789_v22, 1  ;;  %v2181_v39 = vsel %vm825_vm3, %v847_v31, %v848_v19  ;;  %1669 = vmatpush3.bf16.msra.mxu0 %v1187_v35  ;;  %1695 = vmatpush3.bf16.msra.mxu1 %v1187_v35  ;;  %v760_v53 = vshll.u32 %v2178_v36, 16 }
  0x47   : > { %850 = vrot.lane.b32.xlu1 %v828_v51, %s1793_s9  ;;  %v645_v40 = vor.u32 %v643_v25, %v642_v33  ;;  %v694_v41 = vsel %vm1950_vm2, %v642_v33, 0  ;;  %v647_v42 = vshrl.u32 %v582_v34, 16  ;;  %v650_v44 = vshll.u32 %v582_v34, 16 }
  0x48   : > { %854 = vrot.lane.b32.xlu0 %v2028_v26, %s1793_s9  ;;  %v751_v26 = vor.u32 %v750_v49, %v746_v8  ;;  %v691_v51 = vsel %vm1950_vm2, %v2127_v46, 0  ;;  %v787_v52 = vor.u32 %v786_v37, %v782_v28  ;;  %v891_v50 = vshll.u32 %v694_v41, 16 }
  0x49   : > { %v2196_v54 = vsel %vm1950_vm2, 0, %v645_v40  ;;  %v913_v55 = vrot.slane %v694_v41, 1  ;;  %v649_v56 = vrot.slane %v647_v42, 7  ;;  %v840_v58 = vsel %vm825_vm3, %v838_v32, %v839_v0 }
  0x4a   : > { %v756_v48 = vsel %vm696_vm4, %v751_v26, %v755_v11  ;;  %v2200_v59 = vsel %vm696_vm4, %v787_v52, %v791_v38  ;;  %v884_v46 = vshrl.u32 %v2196_v54, 16  ;;  %v886_v61 = vshll.u32 %v2196_v54, 16 }
  0x4b   : > { %856 = vrot.lane.b32.xlu1 %v2040_v43, %s1793_s9  ;;  %v765_v63 = vshll.u32 %v691_v51, 16  ;;  %v912_v2 = vrot.slane %v2196_v54, 1  ;;  %v652_v3 = vor.u32 %v650_v44, %v649_v56  ;;  %v695_v5 = vsel %vm1950_vm2, %v649_v56, 0 }
  0x4c   : > { %793 = vrot.lane.b32.xlu0 %v708_v21, %s1798_s13  ;;  %v758_v6 = vshrl.u32 %v2178_v36, 16  ;;  %v888_v8 = vrot.slane %v886_v61, 1  ;;  %v893_v0 = vrot.slane %v891_v50, 1  ;;  %v956_v9 = vshll.u32 %v695_v5, 16 }
  0x4d   : > { %v762_v10 = vrot.slane %v760_v53, 1  ;;  %v2212_v49 = vsel %vm825_vm3, %v912_v2, %v913_v55  ;;  %v685_v11 = vsel %vm1950_vm2, 0, %v652_v3  ;;  %v978_v13 = vrot.slane %v695_v5, 1 }
  0x4e   : > { %v889_v15 = vor.u32 %v888_v8, %v884_v46  ;;  %v949_v16 = vshrl.u32 %v685_v11, 16  ;;  %v951_v1 = vshll.u32 %v685_v11, 16  ;;  %v977_v17 = vrot.slane %v685_v11, 1 }
  0x4f   : > { %873 = vrot.lane.b32.xlu1 %v2100_v18, %s1791_s22  ;;  %v958_v21 = vrot.slane %v956_v9, 1  ;;  %v767_v22 = vrot.slane %v765_v63, 1  ;;  %v842_v27 = vrot.slane %v691_v51, 1  ;;  %v772_v26 = vshll.u32 %v2131_v47, 16 }
  0x50   : > { %871 = vrot.lane.b32.xlu0 %v1998_v4, %s1791_s22  ;;  %v894_v12 = vsel %vm696_vm4, %v889_v15, %v893_v0  ;;  %v953_v20 = vrot.slane %v951_v1, 1  ;;  %v979_v19 = vsel %vm825_vm3, %v977_v17, %v978_v13  ;;  %v770_v29 = vshrl.u32 %v2131_v47, 16 }
  0x51   : > { %v774_v31 = vrot.slane %v772_v26, 1  ;;  %v777_v32 = vshll.u32 %v2110_v30, 16 }
  0x52   : > { %v954_v45 = vor.u32 %v953_v20, %v949_v16 }
  0x53   : > { %901 = vrot.lane.b32.xlu1 %v756_v48, %s1796_s25  ;;  %v775_v33 = vor.u32 %v774_v31, %v770_v29  ;;  %v779_v34 = vrot.slane %v777_v32, 1 }
  0x54   : > { %899 = vrot.lane.b32.xlu0 %v2068_v7, %s1796_s25  ;;  %v763_v7 = vor.u32 %v762_v10, %v758_v6  ;;  %v959_v23 = vsel %vm696_vm4, %v954_v45, %v958_v21 }
  0x55   : > { %v780_v35 = vsel %vm696_vm4, %v775_v33, %v779_v34 }
  0x56   : > { %v768_v25 = vsel %vm696_vm4, %v763_v7, %v767_v22 }
  0x57   : > { %921 = vrot.lane.b32.xlu1 %v840_v58, %s1794_s15 }
  0x58   : > { %919 = vrot.lane.b32.xlu0 %v2040_v43, %s1794_s15  ;;  %v841_v43 = vrot.slane %v2178_v36, 1 }
  0x5a   : > { %v843_v28 = vsel %vm825_vm3, %v841_v43, %v842_v27 }
  0x5b   : > { %938 = vrot.lane.b32.xlu1 %v2178_v36, %s1792_s23 }
  0x5c   : > { %936 = vrot.lane.b32.xlu0 %v2100_v18, %s1792_s23 }
  0x5f   : > { %966 = vrot.lane.b32.xlu1 %v768_v25, %s1797_s14 }
  0x60   : > { %964 = vrot.lane.b32.xlu0 %v756_v48, %s1797_s14 }
  0x63   : > { %801 = vrot.lane.b32.xlu1 %v756_v48, %s1798_s13 }
  0x64   : > { %984 = vrot.lane.b32.xlu0 %v840_v58, %s1795_s19 }
  0x67   : > { %803 = vrot.lane.b32.xlu1 %v768_v25, %s1798_s13 }
  0x68   : > { %986 = vrot.lane.b32.xlu0 %v843_v28, %s1795_s19 }
  0x6b   : > { %860 = vrot.lane.b32.xlu1 %v843_v28, %s1793_s9 }
  0x6c   : > { %858 = vrot.lane.b32.xlu0 %v840_v58, %s1793_s9 }
  0x6f   : > { %877 = vrot.lane.b32.xlu1 %v2131_v47, %s1791_s22 }
  0x70   : > { %875 = vrot.lane.b32.xlu0 %v2178_v36, %s1791_s22 }
  0x73   : > { %905 = vrot.lane.b32.xlu1 %v780_v35, %s1796_s25 }
  0x74   : > { %903 = vrot.lane.b32.xlu0 %v768_v25, %s1796_s25 }
  0x77   : > { %925 = vrot.lane.b32.xlu1 %v2149_v60, %s1794_s15 }
  0x78   : > { %923 = vrot.lane.b32.xlu0 %v843_v28, %s1794_s15 }
  0x7b   : > { %942 = vrot.lane.b32.xlu1 %v2167_v24, %s1792_s23 }
  0x7c   : > { %940 = vrot.lane.b32.xlu0 %v2131_v47, %s1792_s23 }
  0x7f   : > { %970 = vrot.lane.b32.xlu1 %v2200_v59, %s1797_s14 }
  0x80   : > { %968 = vrot.lane.b32.xlu0 %v780_v35, %s1797_s14 }
  0x83   : > { %805 = vrot.lane.b32.xlu1 %v780_v35, %s1798_s13 }
  0x84   : > { %988 = vrot.lane.b32.xlu0 %v2149_v60, %s1795_s19 }
  0x87   : > { %807 = vrot.lane.b32.xlu1 %v2200_v59, %s1798_s13  ;;  %s2470_s13 = sshll.u32 %s1882_s12, 3  ;;  %s1621_s12 = sshll.u32 %s1980_s8, 1 }
  0x88   : > { %990 = vrot.lane.b32.xlu0 %v2181_v39, %s1795_s19 }
  0x8b   : > { %864 = vrot.lane.b32.xlu1 %v2181_v39, %s1793_s9 }
  0x8c   : > { %862 = vrot.lane.b32.xlu0 %v2149_v60, %s1793_s9  ;;  %s2372_s9 = scalar_lea.vmem %s2464_s6, %s2470_s13 }
  0x8f   : > { %881 = vrot.lane.b32.xlu1 %v2196_v54, %s1791_s22 }
  0x90   : > { %879 = vrot.lane.b32.xlu0 %v2167_v24, %s1791_s22 }
  0x93   : > { %909 = vrot.lane.b32.xlu1 %v894_v12, %s1796_s25 }
  0x94   : > { %907 = vrot.lane.b32.xlu0 %v2200_v59, %s1796_s25  ;;  %s467_s25 = scalar_lea.vmem %s2465_s7, %s1621_s12 }
  0x97   : > { %929 = vrot.lane.b32.xlu1 %v2212_v49, %s1794_s15 }
  0x98   : > { %927 = vrot.lane.b32.xlu0 %v2181_v39, %s1794_s15 }
  0x99   : > { %v870_v30 = vpop.permute.xlu1 %869 }
  0x9a   : > { %v868_v37 = vpop.permute.xlu0 %867 }
  0x9b   : > { %946 = vrot.lane.b32.xlu1 %v685_v11, %s1792_s23 }
  0x9c   : > { %944 = vrot.lane.b32.xlu0 %v2196_v54, %s1792_s23 }
  0x9d   : > { %v935_v60 = vpop.permute.xlu1 %934 }
  0x9e   : > { %v933_v38 = vpop.permute.xlu0 %932 }
  0x9f   : > { %974 = vrot.lane.b32.xlu1 %v959_v23, %s1797_s14 }
  0xa0   : > { %972 = vrot.lane.b32.xlu0 %v894_v12, %s1797_s14 }
  0xa1   : > { %v853_v40 = vpop.permute.xlu1 %852 }
  0xa2   : > { %v916_v41 = vpop.permute.xlu0 %915 }
  0xa3   : > { %994 = vrot.lane.b32.xlu1 %v979_v19, %s1795_s19 }
  0xa4   : > { %992 = vrot.lane.b32.xlu0 %v2212_v49, %s1795_s19 }
  0xa5   : > { %v918_v39 = vpop.permute.xlu1 %917 }
  0xa6   : > { %v981_v42 = vpop.permute.xlu0 %980 }
  0xa9   : > { %v898_v44 = vpop.permute.xlu1 %897 }
  0xaa   : > { %v983_v48 = vpop.permute.xlu0 %982 }
  0xad   : > { %v963_v51 = vpop.permute.xlu1 %962 }
  0xae   : > { %v796_v52 = vpop.permute.xlu0 %795 }
  0xaf   : > { %v1000_v53 = vsel %vm996_vm6, %v1986_v62, %v796_v52 }
  0xb0   : > { %v1017_v55 = vsel %vm1013_vm7, %v1000_v53, %v853_v40 }
  0xb1   : > { %v798_v50 = vpop.permute.xlu1 %797  ;;  %v1034_v59 = vsel %vm1030_vm8, %v1017_v55, %v870_v30 }
  0xb2   : > { %v896_v54 = vpop.permute.xlu0 %895  ;;  %v1051_v63 = vsel %vm1047_vm9, %v1034_v59, %v898_v44  ;;  %v1002_v19 = vsel %vm996_vm6, %v1976_v57, %v798_v50 }
  0xb3   : > { %v1068_v5 = vsel %vm1064_vm10, %v1051_v63, %v918_v39 }
  0xb4   : > { %v1085_v9 = vsel %vm1081_vm11, %v1068_v5, %v935_v60 }
  0xb5   : > { %v800_v56 = vpop.permute.xlu1 %799  ;;  %v1102_v15 = vsel %vm1098_vm12, %v1085_v9, %v963_v51 }
  0xb6   : > { %v961_v58 = vpop.permute.xlu0 %960  ;;  %v1119_v12 = vsel %vm1115_vm13, %v1102_v15, %v983_v48  ;;  %v1004_v26 = vsel %vm996_vm6, %v1998_v4, %v800_v56 }
  0xb9   : > { %v851_v46 = vpop.permute.xlu1 %850 }
  0xba   : > { %v855_v61 = vpop.permute.xlu0 %854 }
  0xbb   : > { %v1019_v45 = vsel %vm1013_vm7, %v1002_v19, %v855_v61 }
  0xbd   : > { %v857_v2 = vpop.permute.xlu1 %856 }
  0xbe   : > { %v794_v3 = vpop.permute.xlu0 %793  ;;  %v1021_v29 = vsel %vm1013_vm7, %v1004_v26, %v857_v2 }
  0xbf   : > { %v998_v62 = vsel %vm996_vm6, %v2082_v14, %v794_v3 }
  0xc0   : > { %v1015_v6 = vsel %vm1013_vm7, %v998_v62, %v851_v46 }
  0xc1   : > { %v1032_v8 = vsel %vm1030_vm8, %v1015_v6, %v868_v37  ;;  %v874_v0 = vpop.permute.xlu1 %873 }
  0xc2   : > { %v1049_v10 = vsel %vm1047_vm9, %v1032_v8, %v896_v54  ;;  %v872_v49 = vpop.permute.xlu0 %871  ;;  %v1038_v57 = vsel %vm1030_vm8, %v1021_v29, %v874_v0 }
  0xc3   : > { %v1066_v11 = vsel %vm1064_vm10, %v1049_v10, %v916_v41  ;;  %v1036_v25 = vsel %vm1030_vm8, %v1019_v45, %v872_v49 }
  0xc4   : > { %v1083_v13 = vsel %vm1081_vm11, %v1066_v11, %v933_v38 }
  0xc5   : > { %v902_v14 = vpop.permute.xlu1 %901  ;;  %v1100_v16 = vsel %vm1098_vm12, %v1083_v13, %v961_v58 }
  0xc6   : > { %v900_v1 = vpop.permute.xlu0 %899  ;;  %v1117_v17 = vsel %vm1115_vm13, %v1100_v16, %v981_v42  ;;  %v1055_v35 = vsel %vm1047_vm9, %v1038_v57, %v902_v14 }
  0xc7   : > { %1670 = vmatprep.mubr.msk.bf16.mxu0 %vm1168_vm14, %v1117_v17  ;;  %v1053_v27 = vsel %vm1047_vm9, %v1036_v25, %v900_v1 }
  0xc8   : > { %1671 = vmatmul.mubr.msk.bf16.vlgmr.msra.gmra.mrb[0].mxu0 %vm1168_vm14, %v1119_v12 }
  0xc9   : > { %v922_v20 = vpop.permute.xlu1 %921 }
  0xca   : > { %v920_v21 = vpop.permute.xlu0 %919  ;;  %v1072_v37 = vsel %vm1064_vm10, %v1055_v35, %v922_v20 }
  0xcb   : > { %v1070_v28 = vsel %vm1064_vm10, %v1053_v27, %v920_v21 }
  0xcd   : > { %v939_v7 = vpop.permute.xlu1 %938 }
  0xce   : > { %v937_v22 = vpop.permute.xlu0 %936  ;;  %v1089_v4 = vsel %vm1081_vm11, %v1072_v37, %v939_v7 }
  0xcf   : > { %v1087_v31 = vsel %vm1081_vm11, %v1070_v28, %v937_v22 }
  0xd1   : > { %v967_v23 = vpop.permute.xlu1 %966 }
  0xd2   : > { %v965_v43 = vpop.permute.xlu0 %964  ;;  %v1106_v38 = vsel %vm1098_vm12, %v1089_v4, %v967_v23 }
  0xd3   : > { %v1104_v33 = vsel %vm1098_vm12, %v1087_v31, %v965_v43 }
  0xd5   : > { %v802_v32 = vpop.permute.xlu1 %801 }
  0xd6   : > { %v985_v34 = vpop.permute.xlu0 %984  ;;  %v1006_v56 = vsel %vm996_vm6, %v2100_v18, %v802_v32 }
  0xd7   : > { %v1121_v30 = vsel %vm1115_vm13, %v1104_v33, %v985_v34 }
  0xd8   : > { %1674 = vmatprep.mubr.msk.bf16.mxu0 %vm1168_vm14, %v1121_v30 }
  0xd9   : > { %v804_v60 = vpop.permute.xlu1 %803 }
  0xda   : > { %v987_v40 = vpop.permute.xlu0 %986  ;;  %v1008_v2 = vsel %vm996_vm6, %v2178_v36, %v804_v60 }
  0xdb   : > { %v1123_v41 = vsel %vm1115_vm13, %v1106_v38, %v987_v40 }
  0xdc   : > { %1675 = vmatmul.mubr.msk.bf16.gmra.mrb[4].mxu0 %vm1168_vm14, %v1123_v41 }
  0xdd   : > { %v861_v39 = vpop.permute.xlu1 %860 }
  0xde   : > { %v859_v42 = vpop.permute.xlu0 %858  ;;  %v1025_v5 = vsel %vm1013_vm7, %v1008_v2, %v861_v39 }
  0xdf   : > { %v1023_v58 = vsel %vm1013_vm7, %v1006_v56, %v859_v42 }
  0xe1   : > { %v878_v44 = vpop.permute.xlu1 %877 }
  0xe2   : > { %v876_v48 = vpop.permute.xlu0 %875  ;;  %v1042_v18 = vsel %vm1030_vm8, %v1025_v5, %v878_v44 }
  0xe3   : > { %v1040_v46 = vsel %vm1030_vm8, %v1023_v58, %v876_v48 }
  0xe5   : > { %v906_v51 = vpop.permute.xlu1 %905 }
  0xe6   : > { %v904_v52 = vpop.permute.xlu0 %903  ;;  %v1059_v9 = vsel %vm1047_vm9, %v1042_v18, %v906_v51 }
  0xe7   : > { %v1057_v63 = vsel %vm1047_vm9, %v1040_v46, %v904_v52 }
  0xe9   : > { %v926_v50 = vpop.permute.xlu1 %925 }
  0xea   : > { %v924_v53 = vpop.permute.xlu0 %923  ;;  %v1076_v49 = vsel %vm1064_vm10, %v1059_v9, %v926_v50 }
  0xeb   : > { %v1074_v3 = vsel %vm1064_vm10, %v1057_v63, %v924_v53 }
  0xed   : > { %v943_v54 = vpop.permute.xlu1 %942 }
  0xee   : > { %v941_v55 = vpop.permute.xlu0 %940  ;;  %v1093_v36 = vsel %vm1081_vm11, %v1076_v49, %v943_v54 }
  0xef   : > { %v1091_v62 = vsel %vm1081_vm11, %v1074_v3, %v941_v55 }
  0xf1   : > { %v971_v59 = vpop.permute.xlu1 %970 }
  0xf2   : > { %v969_v61 = vpop.permute.xlu0 %968  ;;  %v1110_v13 = vsel %vm1098_vm12, %v1093_v36, %v971_v59 }
  0xf3   : > { %v1108_v8 = vsel %vm1098_vm12, %v1091_v62, %v969_v61 }
  0xf5   : > { %v806_v6 = vpop.permute.xlu1 %805 }
  0xf6   : > { %v989_v0 = vpop.permute.xlu0 %988  ;;  %v1010_v25 = vsel %vm996_vm6, %v2131_v47, %v806_v6 }
  0xf7   : > { %v1125_v10 = vsel %vm1115_vm13, %v1108_v8, %v989_v0 }
  0xf8   : > { %1678 = vmatprep.mubr.msk.bf16.mxu1 %vm1168_vm14, %v1125_v10 }
  0xf9   : > { %v808_v11 = vpop.permute.xlu1 %807 }
  0xfa   : > { %v991_v15 = vpop.permute.xlu0 %990  ;;  %v1012_v23 = vsel %vm996_vm6, %v2167_v24, %v808_v11 }
  0xfb   : > { %v1127_v14 = vsel %vm1115_vm13, %v1110_v13, %v991_v15 }
  0xfc   : > { %1679 = vmatmul.mubr.msk.bf16.vlgmr.msra.gmra.mrb[0].mxu1 %vm1168_vm14, %v1127_v14 }
  0xfd   : > { %v865_v16 = vpop.permute.xlu1 %864 }
  0xfe   : > { %v863_v1 = vpop.permute.xlu0 %862  ;;  %v1029_v43 = vsel %vm1013_vm7, %v1012_v23, %v865_v16 }
  0xff   : > { %v1027_v27 = vsel %vm1013_vm7, %v1010_v25, %v863_v1 }
 0x101   : > { %v882_v17 = vpop.permute.xlu1 %881 }
 0x102   : > { %v880_v12 = vpop.permute.xlu0 %879  ;;  %v1046_v26 = vsel %vm1030_vm8, %v1029_v43, %v882_v17 }
 0x103   : > { %v1044_v29 = vsel %vm1030_vm8, %v1027_v27, %v880_v12 }
 0x105   : > { %v910_v20 = vpop.permute.xlu1 %909 }
 0x106   : > { %v908_v21 = vpop.permute.xlu0 %907  ;;  %v1063_v31 = vsel %vm1047_vm9, %v1046_v26, %v910_v20 }
 0x107   : > { %v1061_v57 = vsel %vm1047_vm9, %v1044_v29, %v908_v21 }
 0x109   : > { %v930_v7 = vpop.permute.xlu1 %929 }
 0x10a   : > { %v928_v22 = vpop.permute.xlu0 %927  ;;  %v1080_v24 = vsel %vm1064_vm10, %v1063_v31, %v930_v7 }
 0x10b   : > { %v1078_v33 = vsel %vm1064_vm10, %v1061_v57, %v928_v22 }
 0x10d   : > { %v947_v19 = vpop.permute.xlu1 %946 }
 0x10e   : > { %v945_v45 = vpop.permute.xlu0 %944  ;;  %v1097_v47 = vsel %vm1081_vm11, %v1080_v24, %v947_v19 }
 0x10f   : > { %v1095_v34 = vsel %vm1081_vm11, %v1078_v33, %v945_v45 }
 0x111   : > { %v975_v28 = vpop.permute.xlu1 %974 }
 0x112   : > { %v973_v32 = vpop.permute.xlu0 %972  ;;  %v1114_v35 = vsel %vm1098_vm12, %v1097_v47, %v975_v28 }
 0x113   : > { %v1112_v37 = vsel %vm1098_vm12, %v1095_v34, %v973_v32 }
 0x115   : > { %v995_v30 = vpop.permute.xlu1 %994 }
 0x116   : > { %v1131_v4 = vsel %vm1115_vm13, %v1114_v35, %v995_v30  ;;  %v993_v60 = vpop.permute.xlu0 %992 }
 0x117   : > { %v1129_v38 = vsel %vm1115_vm13, %v1112_v37, %v993_v60 }
 0x118   : > { %1682 = vmatprep.mubr.msk.bf16.mxu1 %vm1168_vm14, %v1129_v38 }
 0x119   : > { %1683 = vmatmul.mubr.msk.bf16.gmra.mrb[4].mxu1 %vm1168_vm14, %v1131_v4 }
 0x19b   : > { %v1672_v40 = vpop.f32.mrb[0].mxu0 }
 0x19c   : > { %1288 = vst.msk [vmem:[%s2372_s9 + $0x10] sm:$0xff] %vm996_vm6, %v1672_v40  ;;  %v1223_v41 = vpop.f32.mrb[1].mxu0  ;;  %v1341_v48 = vmul.f32 %v1672_v40, %v1672_v40  ;;  %v1305_v54 = vsel %vm996_vm6, %v1672_v40, 0.0 }
 0x19d   : > { %1286 = vst.msk [vmem:[%s2372_s9] sm:$0xff] %vm996_vm6, %v1223_v41  ;;  %v1339_v39 = vmul.f32 %v1223_v41, %v1223_v41  ;;  %v1673_v42 = vpop.f32.mrb[2].mxu0  ;;  %v1302_v51 = vsel %vm996_vm6, %v1223_v41, 0.0 }
 0x19e   : > { %1289 = vst.msk [vmem:[%s2372_s9 + $0x18] sm:$0xff] %vm996_vm6, %v1673_v42  ;;  %v1226_v44 = vpop.f32.mrb[3].mxu0  ;;  %v1342_v56 = vmul.f32 %v1673_v42, %v1673_v42  ;;  %v1358_v61 = vsel %vm996_vm6, %v1341_v48, 0.0  ;;  %v1307_v63 = vsel %vm996_vm6, %v1673_v42, 0.0 }
 0x19f   : > { %1287 = vst.msk [vmem:[%s2372_s9 + $0x8] sm:$0xff] %vm996_vm6, %v1226_v44  ;;  %v1303_v52 = vsel %vm996_vm6, %v1226_v44, 0.0  ;;  %v1340_v50 = vmul.f32 %v1226_v44, %v1226_v44  ;;  %v1355_v55 = vsel %vm996_vm6, %v1339_v39, 0.0 }
 0x1a0   : > { %v1304_v53 = vadd.f32 %v1303_v52, %v1302_v51  ;;  %v1360_v5 = vsel %vm996_vm6, %v1342_v56, 0.0 }
 0x1a1   : > { %v1356_v58 = vsel %vm996_vm6, %v1340_v50, 0.0 }
 0x1a2   : > { %v1306_v59 = vadd.f32 %v1305_v54, %v1304_v53  ;;  %v1357_v46 = vadd.f32 %v1356_v58, %v1355_v55 }
 0x1a4   : > { %v1359_v2 = vadd.f32 %v1358_v61, %v1357_v46  ;;  %v1308_v3 = vadd.f32 %v1307_v63, %v1306_v59 }
 0x1a6   : > { %v1361_v62 = vadd.f32 %v1360_v5, %v1359_v2 }
 0x1af   : > { %v1676_v6 = vpop.f32.mrb[4].mxu0 }
 0x1b0   : > { %1292 = vst.msk [vmem:[%s2372_s9 + $0x30] sm:$0xff] %vm996_vm6, %v1676_v6  ;;  %v1239_v18 = vpop.f32.mrb[5].mxu0  ;;  %v1345_v36 = vmul.f32 %v1676_v6, %v1676_v6  ;;  %v1313_v1 = vsel %vm996_vm6, %v1676_v6, 0.0 }
 0x1b1   : > { %1290 = vst.msk [vmem:[%s2372_s9 + $0x20] sm:$0xff] %vm996_vm6, %v1239_v18  ;;  %v1309_v8 = vsel %vm996_vm6, %v1239_v18, 0.0  ;;  %v1343_v0 = vmul.f32 %v1239_v18, %v1239_v18  ;;  %v1677_v9 = vpop.f32.mrb[6].mxu0 }
 0x1b2   : > { %v1310_v10 = vadd.f32 %v1309_v8, %v1308_v3  ;;  %1293 = vst.msk [vmem:[%s2372_s9 + $0x38] sm:$0xff] %vm996_vm6, %v1677_v9  ;;  %v1242_v49 = vpop.f32.mrb[7].mxu0  ;;  %v1346_v17 = vmul.f32 %v1677_v9, %v1677_v9  ;;  %v1366_v7 = vsel %vm996_vm6, %v1345_v36, 0.0  ;;  %v1315_v22 = vsel %vm996_vm6, %v1677_v9, 0.0 }
 0x1b3   : > { %v1362_v11 = vsel %vm996_vm6, %v1343_v0, 0.0  ;;  %1291 = vst.msk [vmem:[%s2372_s9 + $0x28] sm:$0xff] %vm996_vm6, %v1242_v49  ;;  %v1311_v13 = vsel %vm996_vm6, %v1242_v49, 0.0  ;;  %v1344_v15 = vmul.f32 %v1242_v49, %v1242_v49 }
 0x1b4   : > { %v1363_v14 = vadd.f32 %v1362_v11, %v1361_v62  ;;  %v1312_v16 = vadd.f32 %v1311_v13, %v1310_v10  ;;  %v1368_v23 = vsel %vm996_vm6, %v1346_v17, 0.0 }
 0x1b5   : > { %v1364_v12 = vsel %vm996_vm6, %v1344_v15, 0.0 }
 0x1b6   : > { %v1314_v20 = vadd.f32 %v1313_v1, %v1312_v16  ;;  %v1365_v21 = vadd.f32 %v1364_v12, %v1363_v14 }
 0x1b8   : > { %v1367_v19 = vadd.f32 %v1366_v7, %v1365_v21  ;;  %v1316_v45 = vadd.f32 %v1315_v22, %v1314_v20 }
 0x1ba   : > { %v1369_v25 = vadd.f32 %v1368_v23, %v1367_v19 }
 0x1cf   : > { %v1680_v43 = vpop.f32.mrb[0].mxu1 }
 0x1d0   : > { %1296 = vst.msk [vmem:[%s2372_s9 + $0x50] sm:$0xff] %vm996_vm6, %v1680_v43  ;;  %v1255_v27 = vpop.f32.mrb[1].mxu1  ;;  %v1349_v57 = vmul.f32 %v1680_v43, %v1680_v43  ;;  %v1321_v30 = vsel %vm996_vm6, %v1680_v43, 0.0 }
 0x1d1   : > { %1294 = vst.msk [vmem:[%s2372_s9 + $0x40] sm:$0xff] %vm996_vm6, %v1255_v27  ;;  %v1317_v26 = vsel %vm996_vm6, %v1255_v27, 0.0  ;;  %v1347_v28 = vmul.f32 %v1255_v27, %v1255_v27  ;;  %v1681_v29 = vpop.f32.mrb[2].mxu1 }
 0x1d2   : > { %v1318_v31 = vadd.f32 %v1317_v26, %v1316_v45  ;;  %1297 = vst.msk [vmem:[%s2372_s9 + $0x58] sm:$0xff] %vm996_vm6, %v1681_v29  ;;  %v1258_v32 = vpop.f32.mrb[3].mxu1  ;;  %v1350_v37 = vmul.f32 %v1681_v29, %v1681_v29  ;;  %v1374_v40 = vsel %vm996_vm6, %v1349_v57, 0.0  ;;  %v1323_v41 = vsel %vm996_vm6, %v1681_v29, 0.0 }
 0x1d3   : > { %v1370_v24 = vsel %vm996_vm6, %v1347_v28, 0.0  ;;  %1295 = vst.msk [vmem:[%s2372_s9 + $0x48] sm:$0xff] %vm996_vm6, %v1258_v32  ;;  %v1319_v33 = vsel %vm996_vm6, %v1258_v32, 0.0  ;;  %v1348_v47 = vmul.f32 %v1258_v32, %v1258_v32 }
 0x1d4   : > { %v1371_v34 = vadd.f32 %v1370_v24, %v1369_v25  ;;  %v1320_v35 = vadd.f32 %v1319_v33, %v1318_v31  ;;  %v1376_v44 = vsel %vm996_vm6, %v1350_v37, 0.0 }
 0x1d5   : > { %v1372_v4 = vsel %vm996_vm6, %v1348_v47, 0.0 }
 0x1d6   : > { %v1322_v60 = vadd.f32 %v1321_v30, %v1320_v35  ;;  %v1373_v38 = vadd.f32 %v1372_v4, %v1371_v34 }
 0x1d8   : > { %v1375_v39 = vadd.f32 %v1374_v40, %v1373_v38  ;;  %v1324_v42 = vadd.f32 %v1323_v41, %v1322_v60 }
 0x1da   : > { %v1377_v48 = vadd.f32 %v1376_v44, %v1375_v39 }
 0x1ec   : > { %v1684_v51 = vpop.f32.mrb[4].mxu1 }
 0x1ed   : > { %1300 = vst.msk [vmem:[%s2372_s9 + $0x70] sm:$0xff] %vm996_vm6, %v1684_v51  ;;  %v1271_v52 = vpop.f32.mrb[5].mxu1  ;;  %v1353_v58 = vmul.f32 %v1684_v51, %v1684_v51  ;;  %v1329_v3 = vsel %vm996_vm6, %v1684_v51, 0.0 }
 0x1ee   : > { %1298 = vst.msk [vmem:[%s2372_s9 + $0x60] sm:$0xff] %vm996_vm6, %v1271_v52  ;;  %v1325_v50 = vsel %vm996_vm6, %v1271_v52, 0.0  ;;  %v1351_v53 = vmul.f32 %v1271_v52, %v1271_v52  ;;  %v1685_v54 = vpop.f32.mrb[6].mxu1 }
 0x1ef   : > { %v1326_v55 = vadd.f32 %v1325_v50, %v1324_v42  ;;  %1301 = vst.msk [vmem:[%s2372_s9 + $0x78] sm:$0xff] %vm996_vm6, %v1685_v54  ;;  %v1274_v56 = vpop.f32.mrb[7].mxu1  ;;  %v1354_v5 = vmul.f32 %v1685_v54, %v1685_v54  ;;  %v1382_v8 = vsel %vm996_vm6, %v1353_v58, 0.0  ;;  %v1331_v0 = vsel %vm996_vm6, %v1685_v54, 0.0 }
 0x1f0   : > { %v1378_v59 = vsel %vm996_vm6, %v1351_v53, 0.0  ;;  %1299 = vst.msk [vmem:[%s2372_s9 + $0x68] sm:$0xff] %vm996_vm6, %v1274_v56  ;;  %v1327_v46 = vsel %vm996_vm6, %v1274_v56, 0.0  ;;  %v1352_v61 = vmul.f32 %v1274_v56, %v1274_v56 }
 0x1f1   : > { %v1379_v63 = vadd.f32 %v1378_v59, %v1377_v48  ;;  %v1328_v2 = vadd.f32 %v1327_v46, %v1326_v55  ;;  %v1384_v49 = vsel %vm996_vm6, %v1354_v5, 0.0 }
 0x1f2   : > { %v1380_v62 = vsel %vm996_vm6, %v1352_v61, 0.0 }
 0x1f3   : > { %v1330_v6 = vadd.f32 %v1329_v3, %v1328_v2  ;;  %v1381_v18 = vadd.f32 %v1380_v62, %v1379_v63 }
 0x1f5   : > { %v1332_v9 = vadd.f32 %v1331_v0, %v1330_v6  ;;  %v1383_v10 = vadd.f32 %v1382_v8, %v1381_v18 }
 0x1f7   : > { %v1333_v36 = vrot.slane %v1332_v9, 4  ;;  %v1385_v11 = vadd.f32 %v1384_v49, %v1383_v10 }
 0x1f9   : > { %v1334_v13 = vadd.f32 %v1333_v36, %v1332_v9  ;;  %v1386_v15 = vrot.slane %v1385_v11, 4 }
 0x1fb   : > { %v1335_v14 = vrot.slane %v1334_v13, 2  ;;  %v1387_v16 = vadd.f32 %v1386_v15, %v1385_v11 }
 0x1fd   : > { %v1336_v1 = vadd.f32 %v1335_v14, %v1334_v13  ;;  %v1388_v17 = vrot.slane %v1387_v16, 2 }
 0x1ff   : > { %v1337_v12 = vrot.slane %v1336_v1, 1  ;;  %v1389_v20 = vadd.f32 %v1388_v17, %v1387_v16 }
 0x201   : > { %v1390_v21 = vrot.slane %v1389_v20, 1  ;;  %v1338_v7 = vadd.f32 %v1337_v12, %v1336_v1 }
 0x203   : > { %v1391_v22 = vadd.f32 %v1390_v21, %v1389_v20 }
 0x205   : > { %v1393_v19 = vsel %vm673_vm0, %v1338_v7, %v1391_v22 }
 0x206   : > { %1395 = vst.msk [vmem:[%s467_s25] sm:$0x3] %vm1394_vm15, %v1393_v19 }
 0x207 PF: > { %s18_s28 = sadd.s32 1, %s1789_s28   ;;  %s2471_s24 = smov %s1781_s26 }
 0x208   : > { %p15_p12 = scmp.ge.s32.totalorder %s18_s28, 6   ;;  %s2472_s25 = smov %s1785_s27 }
 0x209   : > { %s2473_s26 = smov %s2476_s29  ;;  %s2474_s27 = smov %s2480_s30 }
 0x20a   :  { %17 = sbr.rel (!%p15_p12) target bundleno = 3 (0x3), region = 92 }

</bundles_post_ra>
